<compile_context>
chip_gen: v5e
topology: v5e:2x2
jax: 0.10.0
libtpu: 0.0.40
codegen_flags: <defaults>
</compile_context>

<pallas_src>
import jax
import jax.numpy as jnp
from jax.experimental import pallas as pl
from jax.experimental.pallas import tpu as pltpu

# ----------------------- small synthetic CLIP-ViT config -----------------------
BATCH = 2
IN_CH = 3
RES = 16           # image_resolution
PATCH = 8          # patch size (conv1 kernel == stride)
GRID = RES // PATCH
N_TOK = GRID * GRID + 1   # class token + patches
WIDTH = 32         # transformer width
HEADS = 4
HEAD_DIM = WIDTH // HEADS
LAYERS = 2
MLP_DIM = 4 * WIDTH
EMBED_DIM = 16     # CLIP visual projection dim
N_CLASS = 10       # cls_head output classes
LN_EPS = 1e-5
PDIM = IN_CH * PATCH * PATCH   # flattened patch dim = 192


# ------------------------------ fused Pallas kernel ------------------------------
def _fused_clip_kernel(
    patches_ref, wconv_ref, poscls_ref,
    ln_pre_g_ref, ln_pre_b_ref,
    ln1_g_ref, ln1_b_ref, ln2_g_ref, ln2_b_ref,
    wqkv_ref, bqkv_ref, wout_ref, bout_ref,
    wfc_ref, bfc_ref, wproj_ref, bproj_ref,
    ln_post_g_ref, ln_post_b_ref,
    whead_ref, bhead_ref,
    out_ref,
):
    scale = HEAD_DIM ** -0.5

    def ln(x, g, b):
        mu = jnp.mean(x, axis=-1, keepdims=True)
        xc = x - mu
        var = jnp.mean(xc * xc, axis=-1, keepdims=True)
        return xc * jax.lax.rsqrt(var + LN_EPS) * g + b

    # --- patch-embed conv (stride == kernel) as one matmul.  The class-token
    #     row of `patches` is all-zero; it picks its embedding up from `poscls`
    #     (positional_embedding with class_embedding folded into row 0). ---
    x = jnp.dot(patches_ref[0], wconv_ref[...], preferred_element_type=jnp.float32)
    x = x + poscls_ref[...]                              # (N_TOK, WIDTH)
    x = ln(x, ln_pre_g_ref[...], ln_pre_b_ref[...])      # ln_pre

    for l in range(LAYERS):                              # unrolled (LAYERS=2)
        # ---------------- attention branch ----------------
        h = ln(x, ln1_g_ref[l], ln1_b_ref[l])
        qkv = jnp.dot(h, wqkv_ref[l], preferred_element_type=jnp.float32) + bqkv_ref[l]
        wout_l = wout_ref[l]
        attn = jnp.zeros((N_TOK, WIDTH), jnp.float32)
        for hd in range(HEADS):                          # unrolled static head loop
            c0 = hd * HEAD_DIM
            q = qkv[:, c0:c0 + HEAD_DIM]
            k = qkv[:, WIDTH + c0:WIDTH + c0 + HEAD_DIM]
            v = qkv[:, 2 * WIDTH + c0:2 * WIDTH + c0 + HEAD_DIM]
            s = jnp.dot(q, k.T, preferred_element_type=jnp.float32) * scale
            s = s - jnp.max(s, axis=-1, keepdims=True)
            p = jnp.exp(s)
            p = p * pl.reciprocal(jnp.sum(p, axis=-1, keepdims=True), approx=True)
            o = jnp.dot(p, v, preferred_element_type=jnp.float32)       # (N_TOK, HEAD_DIM)
            # fold this head's slice of the output projection into the loop
            attn = attn + jnp.dot(o, wout_l[c0:c0 + HEAD_DIM, :],
                                  preferred_element_type=jnp.float32)
        x = x + attn + bout_ref[l]
        # ---------------- MLP branch (QuickGELU fused) ----------------
        h = ln(x, ln2_g_ref[l], ln2_b_ref[l])
        h = jnp.dot(h, wfc_ref[l], preferred_element_type=jnp.float32) + bfc_ref[l]
        h = h * jax.nn.sigmoid(1.702 * h)                # QuickGELU
        h = jnp.dot(h, wproj_ref[l], preferred_element_type=jnp.float32) + bproj_ref[l]
        x = x + h

    # --- ln_post on class token; visual projection + cls_head folded into one
    #     matmul: logits = ln_post(x0) @ (proj @ cls_w.T) + cls_b ---
    x0 = ln(x[0:1, :], ln_post_g_ref[...], ln_post_b_ref[...])           # (1, WIDTH)
    logits = jnp.dot(x0, whead_ref[...], preferred_element_type=jnp.float32) + bhead_ref[...]
    out_ref[0] = logits


# --------------------------------- wrapper ---------------------------------
@jax.jit
def clip_image_encoder_forward(image, params):
    B = image.shape[0]
    f32 = jnp.float32

    # ---- layout / algebraic weight prep (pure XLA, jitted with the kernel) ----
    p = image.astype(f32).reshape(B, IN_CH, GRID, PATCH, GRID, PATCH)
    p = p.transpose(0, 2, 4, 1, 3, 5).reshape(B, GRID * GRID, PDIM)
    # prepend an all-zero row per batch for the class-token slot (conv1 has no bias)
    patches = jnp.concatenate([jnp.zeros((B, 1, PDIM), f32), p], axis=1)   # (B, N_TOK, PDIM)

    w_conv = params["conv1_w"].reshape(WIDTH, PDIM).T                      # (PDIM, WIDTH)
    poscls = params["positional_embedding"].at[0].add(params["class_embedding"])  # (N_TOK, W)

    L = params["layers"]
    stk = lambda name: jnp.stack([lp[name] for lp in L])
    wqkv = jnp.stack([lp["attn_in_w"].T for lp in L])                      # (L, W, 3W)
    bqkv = stk("attn_in_b").reshape(LAYERS, 1, 3 * WIDTH)
    wout = jnp.stack([lp["attn_out_w"].T for lp in L])                     # (L, W, W)
    bout = stk("attn_out_b").reshape(LAYERS, 1, WIDTH)
    wfc = jnp.stack([lp["fc_w"].T for lp in L])                            # (L, W, MLP)
    bfc = stk("fc_b").reshape(LAYERS, 1, MLP_DIM)
    wproj = jnp.stack([lp["proj_w"].T for lp in L])                        # (L, MLP, W)
    bproj = stk("proj_b").reshape(LAYERS, 1, WIDTH)
    ln1_g = stk("ln1_g").reshape(LAYERS, 1, WIDTH)
    ln1_b = stk("ln1_b").reshape(LAYERS, 1, WIDTH)
    ln2_g = stk("ln2_g").reshape(LAYERS, 1, WIDTH)
    ln2_b = stk("ln2_b").reshape(LAYERS, 1, WIDTH)
    ln_pre_g = params["ln_pre_g"].reshape(1, WIDTH)
    ln_pre_b = params["ln_pre_b"].reshape(1, WIDTH)
    ln_post_g = params["ln_post_g"].reshape(1, WIDTH)
    ln_post_b = params["ln_post_b"].reshape(1, WIDTH)
    # fold visual projection and cls_head into one linear layer
    w_head = params["proj"] @ params["cls_w"].T                            # (W, N_CLASS)
    b_head = params["cls_b"].reshape(1, N_CLASS)

    weight_args = (w_conv, poscls, ln_pre_g, ln_pre_b,
                   ln1_g, ln1_b, ln2_g, ln2_b,
                   wqkv, bqkv, wout, bout, wfc, bfc, wproj, bproj,
                   ln_post_g, ln_post_b, w_head, b_head)

    def _full_spec(a):
        # whole-array VMEM-resident block, same for every grid step
        if a.ndim == 2:
            return pl.BlockSpec(a.shape, lambda b: (0, 0))
        return pl.BlockSpec(a.shape, lambda b: (0, 0, 0))

    in_specs = [pl.BlockSpec((1, N_TOK, PDIM), lambda b: (b, 0, 0))]       # per-batch patches
    in_specs += [_full_spec(a) for a in weight_args]

    out = pl.pallas_call(
        _fused_clip_kernel,
        out_shape=jax.ShapeDtypeStruct((B, 1, N_CLASS), f32),
        grid=(B,),
        in_specs=in_specs,
        out_specs=pl.BlockSpec((1, 1, N_CLASS), lambda b: (b, 0, 0)),
        compiler_params=pltpu.CompilerParams(dimension_semantics=("parallel",)),
    )(patches, *weight_args)
    return out.reshape(B, N_CLASS)


# --------------------------------- parameter init ---------------------------------
def init_params(key):
    keys = iter(jax.random.split(key, 32))

    def nrm(shape, scale=0.02):
        return (scale * jax.random.normal(next(keys), shape)).astype(jnp.float32)

    params = dict(
        conv1_w=nrm((WIDTH, IN_CH, PATCH, PATCH)),
        class_embedding=nrm((WIDTH,)),
        positional_embedding=nrm((N_TOK, WIDTH)),
        ln_pre_g=jnp.ones((WIDTH,), jnp.float32),
        ln_pre_b=jnp.zeros((WIDTH,), jnp.float32),
        ln_post_g=jnp.ones((WIDTH,), jnp.float32),
        ln_post_b=jnp.zeros((WIDTH,), jnp.float32),
        proj=nrm((WIDTH, EMBED_DIM)),
        cls_w=nrm((N_CLASS, EMBED_DIM)),
        cls_b=jnp.zeros((N_CLASS,), jnp.float32),
        layers=[],
    )
    for _ in range(LAYERS):
        params["layers"].append(dict(
            ln1_g=jnp.ones((WIDTH,), jnp.float32),
            ln1_b=jnp.zeros((WIDTH,), jnp.float32),
            ln2_g=jnp.ones((WIDTH,), jnp.float32),
            ln2_b=jnp.zeros((WIDTH,), jnp.float32),
            attn_in_w=nrm((3 * WIDTH, WIDTH)),
            attn_in_b=jnp.zeros((3 * WIDTH,), jnp.float32),
            attn_out_w=nrm((WIDTH, WIDTH)),
            attn_out_b=jnp.zeros((WIDTH,), jnp.float32),
            fc_w=nrm((MLP_DIM, WIDTH)),
            fc_b=jnp.zeros((MLP_DIM,), jnp.float32),
            proj_w=nrm((WIDTH, MLP_DIM)),
            proj_b=jnp.zeros((WIDTH,), jnp.float32),
        ))
    return params


if __name__ == "__main__":
    key = jax.random.PRNGKey(0)
    pkey, ikey = jax.random.split(key)
    params = init_params(pkey)
    # TODO(synk): pretrained CLIP checkpoint loading is not reproducible here;
    # parameters are deterministic synthetic values of the correct shapes.
    image = jax.random.normal(ikey, (BATCH, IN_CH, RES, RES), dtype=jnp.float32)
    out = clip_image_encoder_forward(image, params)
    out = jax.block_until_ready(out)
    assert out.shape == (BATCH, N_CLASS) and out.dtype == jnp.float32
    assert bool(jnp.all(jnp.isfinite(out)))
    print("KERNEL_OK")
</pallas_src>

<mosaic_0001>
module attributes {stable_mosaic.version = 11 : i64} {
  func.func @_fused_clip_kernel(%arg0: i32, %arg1: memref<1x5x192xf32, #tpu.memory_space<vmem>>, %arg2: memref<192x32xf32, #tpu.memory_space<vmem>>, %arg3: memref<5x32xf32, #tpu.memory_space<vmem>>, %arg4: memref<1x32xf32, #tpu.memory_space<vmem>>, %arg5: memref<1x32xf32, #tpu.memory_space<vmem>>, %arg6: memref<2x1x32xf32, #tpu.memory_space<vmem>>, %arg7: memref<2x1x32xf32, #tpu.memory_space<vmem>>, %arg8: memref<2x1x32xf32, #tpu.memory_space<vmem>>, %arg9: memref<2x1x32xf32, #tpu.memory_space<vmem>>, %arg10: memref<2x32x96xf32, #tpu.memory_space<vmem>>, %arg11: memref<2x1x96xf32, #tpu.memory_space<vmem>>, %arg12: memref<2x32x32xf32, #tpu.memory_space<vmem>>, %arg13: memref<2x1x32xf32, #tpu.memory_space<vmem>>, %arg14: memref<2x32x128xf32, #tpu.memory_space<vmem>>, %arg15: memref<2x1x128xf32, #tpu.memory_space<vmem>>, %arg16: memref<2x128x32xf32, #tpu.memory_space<vmem>>, %arg17: memref<2x1x32xf32, #tpu.memory_space<vmem>>, %arg18: memref<1x32xf32, #tpu.memory_space<vmem>>, %arg19: memref<1x32xf32, #tpu.memory_space<vmem>>, %arg20: memref<32x10xf32, #tpu.memory_space<vmem>>, %arg21: memref<1x10xf32, #tpu.memory_space<vmem>>, %arg22: memref<1x1x10xf32, #tpu.memory_space<vmem>>) attributes {dimension_semantics = [#tpu.dimension_semantics<parallel>], iteration_bounds = array<i64: 2>, scalar_prefetch = 0 : i64, scratch_operands = 0 : i64, tpu.core_type = #tpu.core_type<tc>, window_params = [{transform_indices = @transform_0, window_bounds = array<i64: 1, 5, 192>}, {pipeline_mode = #tpu.pipeline_mode<synchronous>, transform_indices = @transform_1, window_bounds = array<i64: 192, 32>}, {pipeline_mode = #tpu.pipeline_mode<synchronous>, transform_indices = @transform_2, window_bounds = array<i64: 5, 32>}, {pipeline_mode = #tpu.pipeline_mode<synchronous>, transform_indices = @transform_3, window_bounds = array<i64: 1, 32>}, {pipeline_mode = #tpu.pipeline_mode<synchronous>, transform_indices = @transform_4, window_bounds = array<i64: 1, 32>}, {pipeline_mode = #tpu.pipeline_mode<synchronous>, transform_indices = @transform_5, window_bounds = array<i64: 2, 1, 32>}, {pipeline_mode = #tpu.pipeline_mode<synchronous>, transform_indices = @transform_6, window_bounds = array<i64: 2, 1, 32>}, {pipeline_mode = #tpu.pipeline_mode<synchronous>, transform_indices = @transform_7, window_bounds = array<i64: 2, 1, 32>}, {pipeline_mode = #tpu.pipeline_mode<synchronous>, transform_indices = @transform_8, window_bounds = array<i64: 2, 1, 32>}, {pipeline_mode = #tpu.pipeline_mode<synchronous>, transform_indices = @transform_9, window_bounds = array<i64: 2, 32, 96>}, {pipeline_mode = #tpu.pipeline_mode<synchronous>, transform_indices = @transform_10, window_bounds = array<i64: 2, 1, 96>}, {pipeline_mode = #tpu.pipeline_mode<synchronous>, transform_indices = @transform_11, window_bounds = array<i64: 2, 32, 32>}, {pipeline_mode = #tpu.pipeline_mode<synchronous>, transform_indices = @transform_12, window_bounds = array<i64: 2, 1, 32>}, {pipeline_mode = #tpu.pipeline_mode<synchronous>, transform_indices = @transform_13, window_bounds = array<i64: 2, 32, 128>}, {pipeline_mode = #tpu.pipeline_mode<synchronous>, transform_indices = @transform_14, window_bounds = array<i64: 2, 1, 128>}, {pipeline_mode = #tpu.pipeline_mode<synchronous>, transform_indices = @transform_15, window_bounds = array<i64: 2, 128, 32>}, {pipeline_mode = #tpu.pipeline_mode<synchronous>, transform_indices = @transform_16, window_bounds = array<i64: 2, 1, 32>}, {pipeline_mode = #tpu.pipeline_mode<synchronous>, transform_indices = @transform_17, window_bounds = array<i64: 1, 32>}, {pipeline_mode = #tpu.pipeline_mode<synchronous>, transform_indices = @transform_18, window_bounds = array<i64: 1, 32>}, {pipeline_mode = #tpu.pipeline_mode<synchronous>, transform_indices = @transform_19, window_bounds = array<i64: 32, 10>}, {pipeline_mode = #tpu.pipeline_mode<synchronous>, transform_indices = @transform_20, window_bounds = array<i64: 1, 10>}, {transform_indices = @transform_21, window_bounds = array<i64: 1, 1, 10>}]} {
    %c0 = arith.constant 0 : index
    %c0_0 = arith.constant 0 : index
    %c0_1 = arith.constant 0 : index
    %0 = vector.load %arg1[%c0, %c0_0, %c0_1] : memref<1x5x192xf32, #tpu.memory_space<vmem>>, vector<1x5x192xf32>
    %1 = vector.shape_cast %0 : vector<1x5x192xf32> to vector<5x192xf32>
    %c0_2 = arith.constant 0 : index
    %c0_3 = arith.constant 0 : index
    %2 = vector.load %arg2[%c0_2, %c0_3] : memref<192x32xf32, #tpu.memory_space<vmem>>, vector<192x32xf32>
    %cst = arith.constant dense<0.000000e+00> : vector<5x32xf32>
    %3 = tpu.matmul %1, %2, %cst {dimension_numbers = #tpu.dot_dimension_numbers<[1], [0], [0], [1], [0, 0, 1, 1], [], []>} : vector<5x192xf32>, vector<192x32xf32>, vector<5x32xf32> -> vector<5x32xf32>
    %c0_4 = arith.constant 0 : index
    %c0_5 = arith.constant 0 : index
    %4 = vector.load %arg3[%c0_4, %c0_5] : memref<5x32xf32, #tpu.memory_space<vmem>>, vector<5x32xf32>
    %5 = arith.addf %3, %4 : vector<5x32xf32>
    %c0_6 = arith.constant 0 : index
    %c0_7 = arith.constant 0 : index
    %6 = vector.load %arg4[%c0_6, %c0_7] : memref<1x32xf32, #tpu.memory_space<vmem>>, vector<1x32xf32>
    %c0_8 = arith.constant 0 : index
    %c0_9 = arith.constant 0 : index
    %7 = vector.load %arg5[%c0_8, %c0_9] : memref<1x32xf32, #tpu.memory_space<vmem>>, vector<1x32xf32>
    %cst_10 = arith.constant dense<0.000000e+00> : vector<5xf32>
    %8 = vector.multi_reduction <add>, %5, %cst_10 [1] : vector<5x32xf32> to vector<5xf32>
    %9 = vector.shape_cast %8 : vector<5xf32> to vector<5x1xf32>
    %cst_11 = arith.constant 3.200000e+01 : f32
    %10 = vector.broadcast %cst_11 : f32 to vector<5x1xf32>
    %11 = arith.divf %9, %10 : vector<5x1xf32>
    %12 = vector.broadcast %11 : vector<5x1xf32> to vector<5x32xf32>
    %13 = arith.subf %5, %12 : vector<5x32xf32>
    %14 = arith.mulf %13, %13 : vector<5x32xf32>
    %cst_12 = arith.constant dense<0.000000e+00> : vector<5xf32>
    %15 = vector.multi_reduction <add>, %14, %cst_12 [1] : vector<5x32xf32> to vector<5xf32>
    %16 = vector.shape_cast %15 : vector<5xf32> to vector<5x1xf32>
    %cst_13 = arith.constant 3.200000e+01 : f32
    %17 = vector.broadcast %cst_13 : f32 to vector<5x1xf32>
    %18 = arith.divf %16, %17 : vector<5x1xf32>
    %cst_14 = arith.constant 9.99999974E-6 : f32
    %19 = vector.broadcast %cst_14 : f32 to vector<5x1xf32>
    %20 = arith.addf %18, %19 : vector<5x1xf32>
    %21 = math.rsqrt %20 : vector<5x1xf32>
    %22 = vector.broadcast %21 : vector<5x1xf32> to vector<5x32xf32>
    %23 = arith.mulf %13, %22 : vector<5x32xf32>
    %24 = vector.broadcast %6 : vector<1x32xf32> to vector<5x32xf32>
    %25 = arith.mulf %23, %24 : vector<5x32xf32>
    %26 = vector.broadcast %7 : vector<1x32xf32> to vector<5x32xf32>
    %27 = arith.addf %25, %26 : vector<5x32xf32>
    %c0_15 = arith.constant 0 : index
    %c0_16 = arith.constant 0 : index
    %c0_17 = arith.constant 0 : index
    %28 = vector.load %arg6[%c0_15, %c0_16, %c0_17] : memref<2x1x32xf32, #tpu.memory_space<vmem>>, vector<1x1x32xf32>
    %29 = vector.shape_cast %28 : vector<1x1x32xf32> to vector<1x32xf32>
    %c0_18 = arith.constant 0 : index
    %c0_19 = arith.constant 0 : index
    %c0_20 = arith.constant 0 : index
    %30 = vector.load %arg7[%c0_18, %c0_19, %c0_20] : memref<2x1x32xf32, #tpu.memory_space<vmem>>, vector<1x1x32xf32>
    %31 = vector.shape_cast %30 : vector<1x1x32xf32> to vector<1x32xf32>
    %cst_21 = arith.constant dense<0.000000e+00> : vector<5xf32>
    %32 = vector.multi_reduction <add>, %27, %cst_21 [1] : vector<5x32xf32> to vector<5xf32>
    %33 = vector.shape_cast %32 : vector<5xf32> to vector<5x1xf32>
    %cst_22 = arith.constant 3.200000e+01 : f32
    %34 = vector.broadcast %cst_22 : f32 to vector<5x1xf32>
    %35 = arith.divf %33, %34 : vector<5x1xf32>
    %36 = vector.broadcast %35 : vector<5x1xf32> to vector<5x32xf32>
    %37 = arith.subf %27, %36 : vector<5x32xf32>
    %38 = arith.mulf %37, %37 : vector<5x32xf32>
    %cst_23 = arith.constant dense<0.000000e+00> : vector<5xf32>
    %39 = vector.multi_reduction <add>, %38, %cst_23 [1] : vector<5x32xf32> to vector<5xf32>
    %40 = vector.shape_cast %39 : vector<5xf32> to vector<5x1xf32>
    %cst_24 = arith.constant 3.200000e+01 : f32
    %41 = vector.broadcast %cst_24 : f32 to vector<5x1xf32>
    %42 = arith.divf %40, %41 : vector<5x1xf32>
    %cst_25 = arith.constant 9.99999974E-6 : f32
    %43 = vector.broadcast %cst_25 : f32 to vector<5x1xf32>
    %44 = arith.addf %42, %43 : vector<5x1xf32>
    %45 = math.rsqrt %44 : vector<5x1xf32>
    %46 = vector.broadcast %45 : vector<5x1xf32> to vector<5x32xf32>
    %47 = arith.mulf %37, %46 : vector<5x32xf32>
    %48 = vector.broadcast %29 : vector<1x32xf32> to vector<5x32xf32>
    %49 = arith.mulf %47, %48 : vector<5x32xf32>
    %50 = vector.broadcast %31 : vector<1x32xf32> to vector<5x32xf32>
    %51 = arith.addf %49, %50 : vector<5x32xf32>
    %c0_26 = arith.constant 0 : index
    %c0_27 = arith.constant 0 : index
    %c0_28 = arith.constant 0 : index
    %52 = vector.load %arg10[%c0_26, %c0_27, %c0_28] : memref<2x32x96xf32, #tpu.memory_space<vmem>>, vector<1x32x96xf32>
    %53 = vector.shape_cast %52 : vector<1x32x96xf32> to vector<32x96xf32>
    %cst_29 = arith.constant dense<0.000000e+00> : vector<5x96xf32>
    %54 = tpu.matmul %51, %53, %cst_29 {dimension_numbers = #tpu.dot_dimension_numbers<[1], [0], [0], [1], [0, 0, 1, 1], [], []>} : vector<5x32xf32>, vector<32x96xf32>, vector<5x96xf32> -> vector<5x96xf32>
    %c0_30 = arith.constant 0 : index
    %c0_31 = arith.constant 0 : index
    %c0_32 = arith.constant 0 : index
    %55 = vector.load %arg11[%c0_30, %c0_31, %c0_32] : memref<2x1x96xf32, #tpu.memory_space<vmem>>, vector<1x1x96xf32>
    %56 = vector.shape_cast %55 : vector<1x1x96xf32> to vector<1x96xf32>
    %57 = vector.broadcast %56 : vector<1x96xf32> to vector<5x96xf32>
    %58 = arith.addf %54, %57 : vector<5x96xf32>
    %c0_33 = arith.constant 0 : index
    %c0_34 = arith.constant 0 : index
    %c0_35 = arith.constant 0 : index
    %59 = vector.load %arg12[%c0_33, %c0_34, %c0_35] : memref<2x32x32xf32, #tpu.memory_space<vmem>>, vector<1x32x32xf32>
    %60 = vector.shape_cast %59 : vector<1x32x32xf32> to vector<32x32xf32>
    %cst_36 = arith.constant 0.000000e+00 : f32
    %61 = vector.broadcast %cst_36 : f32 to vector<5x32xf32>
    %62 = vector.extract_strided_slice %58 {offsets = [0, 0], sizes = [5, 8], strides = [1, 1]} : vector<5x96xf32> to vector<5x8xf32>
    %63 = vector.extract_strided_slice %58 {offsets = [0, 32], sizes = [5, 8], strides = [1, 1]} : vector<5x96xf32> to vector<5x8xf32>
    %64 = vector.extract_strided_slice %58 {offsets = [0, 64], sizes = [5, 8], strides = [1, 1]} : vector<5x96xf32> to vector<5x8xf32>
    %65 = tpu.transpose %63, [1, 0] : vector<5x8xf32> -> vector<8x5xf32>
    %cst_37 = arith.constant dense<0.000000e+00> : vector<5x5xf32>
    %66 = tpu.matmul %62, %65, %cst_37 {dimension_numbers = #tpu.dot_dimension_numbers<[1], [0], [0], [1], [0, 0, 1, 1], [], []>} : vector<5x8xf32>, vector<8x5xf32>, vector<5x5xf32> -> vector<5x5xf32>
    %cst_38 = arith.constant 0.353553385 : f32
    %67 = vector.broadcast %cst_38 : f32 to vector<5x5xf32>
    %68 = arith.mulf %66, %67 : vector<5x5xf32>
    %cst_39 = arith.constant dense<0xFF800000> : vector<5xf32>
    %69 = vector.multi_reduction <maximumf>, %68, %cst_39 [1] : vector<5x5xf32> to vector<5xf32>
    %70 = vector.shape_cast %69 : vector<5xf32> to vector<5x1xf32>
    %71 = vector.broadcast %70 : vector<5x1xf32> to vector<5x5xf32>
    %72 = arith.subf %68, %71 : vector<5x5xf32>
    %73 = math.exp %72 : vector<5x5xf32>
    %cst_40 = arith.constant dense<0.000000e+00> : vector<5xf32>
    %74 = vector.multi_reduction <add>, %73, %cst_40 [1] : vector<5x5xf32> to vector<5xf32>
    %75 = vector.shape_cast %74 : vector<5xf32> to vector<5x1xf32>
    %76 = tpu.reciprocal %75 {approx = true} : vector<5x1xf32> -> vector<5x1xf32>
    %77 = vector.broadcast %76 : vector<5x1xf32> to vector<5x5xf32>
    %78 = arith.mulf %73, %77 : vector<5x5xf32>
    %cst_41 = arith.constant dense<0.000000e+00> : vector<5x8xf32>
    %79 = tpu.matmul %78, %64, %cst_41 {dimension_numbers = #tpu.dot_dimension_numbers<[1], [0], [0], [1], [0, 0, 1, 1], [], []>} : vector<5x5xf32>, vector<5x8xf32>, vector<5x8xf32> -> vector<5x8xf32>
    %80 = vector.extract_strided_slice %60 {offsets = [0, 0], sizes = [8, 32], strides = [1, 1]} : vector<32x32xf32> to vector<8x32xf32>
    %cst_42 = arith.constant dense<0.000000e+00> : vector<5x32xf32>
    %81 = tpu.matmul %79, %80, %cst_42 {dimension_numbers = #tpu.dot_dimension_numbers<[1], [0], [0], [1], [0, 0, 1, 1], [], []>} : vector<5x8xf32>, vector<8x32xf32>, vector<5x32xf32> -> vector<5x32xf32>
    %82 = arith.addf %61, %81 : vector<5x32xf32>
    %83 = vector.extract_strided_slice %58 {offsets = [0, 8], sizes = [5, 8], strides = [1, 1]} : vector<5x96xf32> to vector<5x8xf32>
    %84 = vector.extract_strided_slice %58 {offsets = [0, 40], sizes = [5, 8], strides = [1, 1]} : vector<5x96xf32> to vector<5x8xf32>
    %85 = vector.extract_strided_slice %58 {offsets = [0, 72], sizes = [5, 8], strides = [1, 1]} : vector<5x96xf32> to vector<5x8xf32>
    %86 = tpu.transpose %84, [1, 0] : vector<5x8xf32> -> vector<8x5xf32>
    %cst_43 = arith.constant dense<0.000000e+00> : vector<5x5xf32>
    %87 = tpu.matmul %83, %86, %cst_43 {dimension_numbers = #tpu.dot_dimension_numbers<[1], [0], [0], [1], [0, 0, 1, 1], [], []>} : vector<5x8xf32>, vector<8x5xf32>, vector<5x5xf32> -> vector<5x5xf32>
    %cst_44 = arith.constant 0.353553385 : f32
    %88 = vector.broadcast %cst_44 : f32 to vector<5x5xf32>
    %89 = arith.mulf %87, %88 : vector<5x5xf32>
    %cst_45 = arith.constant dense<0xFF800000> : vector<5xf32>
    %90 = vector.multi_reduction <maximumf>, %89, %cst_45 [1] : vector<5x5xf32> to vector<5xf32>
    %91 = vector.shape_cast %90 : vector<5xf32> to vector<5x1xf32>
    %92 = vector.broadcast %91 : vector<5x1xf32> to vector<5x5xf32>
    %93 = arith.subf %89, %92 : vector<5x5xf32>
    %94 = math.exp %93 : vector<5x5xf32>
    %cst_46 = arith.constant dense<0.000000e+00> : vector<5xf32>
    %95 = vector.multi_reduction <add>, %94, %cst_46 [1] : vector<5x5xf32> to vector<5xf32>
    %96 = vector.shape_cast %95 : vector<5xf32> to vector<5x1xf32>
    %97 = tpu.reciprocal %96 {approx = true} : vector<5x1xf32> -> vector<5x1xf32>
    %98 = vector.broadcast %97 : vector<5x1xf32> to vector<5x5xf32>
    %99 = arith.mulf %94, %98 : vector<5x5xf32>
    %cst_47 = arith.constant dense<0.000000e+00> : vector<5x8xf32>
    %100 = tpu.matmul %99, %85, %cst_47 {dimension_numbers = #tpu.dot_dimension_numbers<[1], [0], [0], [1], [0, 0, 1, 1], [], []>} : vector<5x5xf32>, vector<5x8xf32>, vector<5x8xf32> -> vector<5x8xf32>
    %101 = vector.extract_strided_slice %60 {offsets = [8, 0], sizes = [8, 32], strides = [1, 1]} : vector<32x32xf32> to vector<8x32xf32>
    %cst_48 = arith.constant dense<0.000000e+00> : vector<5x32xf32>
    %102 = tpu.matmul %100, %101, %cst_48 {dimension_numbers = #tpu.dot_dimension_numbers<[1], [0], [0], [1], [0, 0, 1, 1], [], []>} : vector<5x8xf32>, vector<8x32xf32>, vector<5x32xf32> -> vector<5x32xf32>
    %103 = arith.addf %82, %102 : vector<5x32xf32>
    %104 = vector.extract_strided_slice %58 {offsets = [0, 16], sizes = [5, 8], strides = [1, 1]} : vector<5x96xf32> to vector<5x8xf32>
    %105 = vector.extract_strided_slice %58 {offsets = [0, 48], sizes = [5, 8], strides = [1, 1]} : vector<5x96xf32> to vector<5x8xf32>
    %106 = vector.extract_strided_slice %58 {offsets = [0, 80], sizes = [5, 8], strides = [1, 1]} : vector<5x96xf32> to vector<5x8xf32>
    %107 = tpu.transpose %105, [1, 0] : vector<5x8xf32> -> vector<8x5xf32>
    %cst_49 = arith.constant dense<0.000000e+00> : vector<5x5xf32>
    %108 = tpu.matmul %104, %107, %cst_49 {dimension_numbers = #tpu.dot_dimension_numbers<[1], [0], [0], [1], [0, 0, 1, 1], [], []>} : vector<5x8xf32>, vector<8x5xf32>, vector<5x5xf32> -> vector<5x5xf32>
    %cst_50 = arith.constant 0.353553385 : f32
    %109 = vector.broadcast %cst_50 : f32 to vector<5x5xf32>
    %110 = arith.mulf %108, %109 : vector<5x5xf32>
    %cst_51 = arith.constant dense<0xFF800000> : vector<5xf32>
    %111 = vector.multi_reduction <maximumf>, %110, %cst_51 [1] : vector<5x5xf32> to vector<5xf32>
    %112 = vector.shape_cast %111 : vector<5xf32> to vector<5x1xf32>
    %113 = vector.broadcast %112 : vector<5x1xf32> to vector<5x5xf32>
    %114 = arith.subf %110, %113 : vector<5x5xf32>
    %115 = math.exp %114 : vector<5x5xf32>
    %cst_52 = arith.constant dense<0.000000e+00> : vector<5xf32>
    %116 = vector.multi_reduction <add>, %115, %cst_52 [1] : vector<5x5xf32> to vector<5xf32>
    %117 = vector.shape_cast %116 : vector<5xf32> to vector<5x1xf32>
    %118 = tpu.reciprocal %117 {approx = true} : vector<5x1xf32> -> vector<5x1xf32>
    %119 = vector.broadcast %118 : vector<5x1xf32> to vector<5x5xf32>
    %120 = arith.mulf %115, %119 : vector<5x5xf32>
    %cst_53 = arith.constant dense<0.000000e+00> : vector<5x8xf32>
    %121 = tpu.matmul %120, %106, %cst_53 {dimension_numbers = #tpu.dot_dimension_numbers<[1], [0], [0], [1], [0, 0, 1, 1], [], []>} : vector<5x5xf32>, vector<5x8xf32>, vector<5x8xf32> -> vector<5x8xf32>
    %122 = vector.extract_strided_slice %60 {offsets = [16, 0], sizes = [8, 32], strides = [1, 1]} : vector<32x32xf32> to vector<8x32xf32>
    %cst_54 = arith.constant dense<0.000000e+00> : vector<5x32xf32>
    %123 = tpu.matmul %121, %122, %cst_54 {dimension_numbers = #tpu.dot_dimension_numbers<[1], [0], [0], [1], [0, 0, 1, 1], [], []>} : vector<5x8xf32>, vector<8x32xf32>, vector<5x32xf32> -> vector<5x32xf32>
    %124 = arith.addf %103, %123 : vector<5x32xf32>
    %125 = vector.extract_strided_slice %58 {offsets = [0, 24], sizes = [5, 8], strides = [1, 1]} : vector<5x96xf32> to vector<5x8xf32>
    %126 = vector.extract_strided_slice %58 {offsets = [0, 56], sizes = [5, 8], strides = [1, 1]} : vector<5x96xf32> to vector<5x8xf32>
    %127 = vector.extract_strided_slice %58 {offsets = [0, 88], sizes = [5, 8], strides = [1, 1]} : vector<5x96xf32> to vector<5x8xf32>
    %128 = tpu.transpose %126, [1, 0] : vector<5x8xf32> -> vector<8x5xf32>
    %cst_55 = arith.constant dense<0.000000e+00> : vector<5x5xf32>
    %129 = tpu.matmul %125, %128, %cst_55 {dimension_numbers = #tpu.dot_dimension_numbers<[1], [0], [0], [1], [0, 0, 1, 1], [], []>} : vector<5x8xf32>, vector<8x5xf32>, vector<5x5xf32> -> vector<5x5xf32>
    %cst_56 = arith.constant 0.353553385 : f32
    %130 = vector.broadcast %cst_56 : f32 to vector<5x5xf32>
    %131 = arith.mulf %129, %130 : vector<5x5xf32>
    %cst_57 = arith.constant dense<0xFF800000> : vector<5xf32>
    %132 = vector.multi_reduction <maximumf>, %131, %cst_57 [1] : vector<5x5xf32> to vector<5xf32>
    %133 = vector.shape_cast %132 : vector<5xf32> to vector<5x1xf32>
    %134 = vector.broadcast %133 : vector<5x1xf32> to vector<5x5xf32>
    %135 = arith.subf %131, %134 : vector<5x5xf32>
    %136 = math.exp %135 : vector<5x5xf32>
    %cst_58 = arith.constant dense<0.000000e+00> : vector<5xf32>
    %137 = vector.multi_reduction <add>, %136, %cst_58 [1] : vector<5x5xf32> to vector<5xf32>
    %138 = vector.shape_cast %137 : vector<5xf32> to vector<5x1xf32>
    %139 = tpu.reciprocal %138 {approx = true} : vector<5x1xf32> -> vector<5x1xf32>
    %140 = vector.broadcast %139 : vector<5x1xf32> to vector<5x5xf32>
    %141 = arith.mulf %136, %140 : vector<5x5xf32>
    %cst_59 = arith.constant dense<0.000000e+00> : vector<5x8xf32>
    %142 = tpu.matmul %141, %127, %cst_59 {dimension_numbers = #tpu.dot_dimension_numbers<[1], [0], [0], [1], [0, 0, 1, 1], [], []>} : vector<5x5xf32>, vector<5x8xf32>, vector<5x8xf32> -> vector<5x8xf32>
    %143 = vector.extract_strided_slice %60 {offsets = [24, 0], sizes = [8, 32], strides = [1, 1]} : vector<32x32xf32> to vector<8x32xf32>
    %cst_60 = arith.constant dense<0.000000e+00> : vector<5x32xf32>
    %144 = tpu.matmul %142, %143, %cst_60 {dimension_numbers = #tpu.dot_dimension_numbers<[1], [0], [0], [1], [0, 0, 1, 1], [], []>} : vector<5x8xf32>, vector<8x32xf32>, vector<5x32xf32> -> vector<5x32xf32>
    %145 = arith.addf %124, %144 : vector<5x32xf32>
    %146 = arith.addf %27, %145 : vector<5x32xf32>
    %c0_61 = arith.constant 0 : index
    %c0_62 = arith.constant 0 : index
    %c0_63 = arith.constant 0 : index
    %147 = vector.load %arg13[%c0_61, %c0_62, %c0_63] : memref<2x1x32xf32, #tpu.memory_space<vmem>>, vector<1x1x32xf32>
    %148 = vector.shape_cast %147 : vector<1x1x32xf32> to vector<1x32xf32>
    %149 = vector.broadcast %148 : vector<1x32xf32> to vector<5x32xf32>
    %150 = arith.addf %146, %149 : vector<5x32xf32>
    %c0_64 = arith.constant 0 : index
    %c0_65 = arith.constant 0 : index
    %c0_66 = arith.constant 0 : index
    %151 = vector.load %arg8[%c0_64, %c0_65, %c0_66] : memref<2x1x32xf32, #tpu.memory_space<vmem>>, vector<1x1x32xf32>
    %152 = vector.shape_cast %151 : vector<1x1x32xf32> to vector<1x32xf32>
    %c0_67 = arith.constant 0 : index
    %c0_68 = arith.constant 0 : index
    %c0_69 = arith.constant 0 : index
    %153 = vector.load %arg9[%c0_67, %c0_68, %c0_69] : memref<2x1x32xf32, #tpu.memory_space<vmem>>, vector<1x1x32xf32>
    %154 = vector.shape_cast %153 : vector<1x1x32xf32> to vector<1x32xf32>
    %cst_70 = arith.constant dense<0.000000e+00> : vector<5xf32>
    %155 = vector.multi_reduction <add>, %150, %cst_70 [1] : vector<5x32xf32> to vector<5xf32>
    %156 = vector.shape_cast %155 : vector<5xf32> to vector<5x1xf32>
    %cst_71 = arith.constant 3.200000e+01 : f32
    %157 = vector.broadcast %cst_71 : f32 to vector<5x1xf32>
    %158 = arith.divf %156, %157 : vector<5x1xf32>
    %159 = vector.broadcast %158 : vector<5x1xf32> to vector<5x32xf32>
    %160 = arith.subf %150, %159 : vector<5x32xf32>
    %161 = arith.mulf %160, %160 : vector<5x32xf32>
    %cst_72 = arith.constant dense<0.000000e+00> : vector<5xf32>
    %162 = vector.multi_reduction <add>, %161, %cst_72 [1] : vector<5x32xf32> to vector<5xf32>
    %163 = vector.shape_cast %162 : vector<5xf32> to vector<5x1xf32>
    %cst_73 = arith.constant 3.200000e+01 : f32
    %164 = vector.broadcast %cst_73 : f32 to vector<5x1xf32>
    %165 = arith.divf %163, %164 : vector<5x1xf32>
    %cst_74 = arith.constant 9.99999974E-6 : f32
    %166 = vector.broadcast %cst_74 : f32 to vector<5x1xf32>
    %167 = arith.addf %165, %166 : vector<5x1xf32>
    %168 = math.rsqrt %167 : vector<5x1xf32>
    %169 = vector.broadcast %168 : vector<5x1xf32> to vector<5x32xf32>
    %170 = arith.mulf %160, %169 : vector<5x32xf32>
    %171 = vector.broadcast %152 : vector<1x32xf32> to vector<5x32xf32>
    %172 = arith.mulf %170, %171 : vector<5x32xf32>
    %173 = vector.broadcast %154 : vector<1x32xf32> to vector<5x32xf32>
    %174 = arith.addf %172, %173 : vector<5x32xf32>
    %c0_75 = arith.constant 0 : index
    %c0_76 = arith.constant 0 : index
    %c0_77 = arith.constant 0 : index
    %175 = vector.load %arg14[%c0_75, %c0_76, %c0_77] : memref<2x32x128xf32, #tpu.memory_space<vmem>>, vector<1x32x128xf32>
    %176 = vector.shape_cast %175 : vector<1x32x128xf32> to vector<32x128xf32>
    %cst_78 = arith.constant dense<0.000000e+00> : vector<5x128xf32>
    %177 = tpu.matmul %174, %176, %cst_78 {dimension_numbers = #tpu.dot_dimension_numbers<[1], [0], [0], [1], [0, 0, 1, 1], [], []>} : vector<5x32xf32>, vector<32x128xf32>, vector<5x128xf32> -> vector<5x128xf32>
    %c0_79 = arith.constant 0 : index
    %c0_80 = arith.constant 0 : index
    %c0_81 = arith.constant 0 : index
    %178 = vector.load %arg15[%c0_79, %c0_80, %c0_81] : memref<2x1x128xf32, #tpu.memory_space<vmem>>, vector<1x1x128xf32>
    %179 = vector.shape_cast %178 : vector<1x1x128xf32> to vector<1x128xf32>
    %180 = vector.broadcast %179 : vector<1x128xf32> to vector<5x128xf32>
    %181 = arith.addf %177, %180 : vector<5x128xf32>
    %cst_82 = arith.constant 1.702000e+00 : f32
    %182 = vector.broadcast %cst_82 : f32 to vector<5x128xf32>
    %183 = arith.mulf %182, %181 : vector<5x128xf32>
    %184 = arith.negf %183 : vector<5x128xf32>
    %185 = math.exp %184 : vector<5x128xf32>
    %cst_83 = arith.constant 1.000000e+00 : f32
    %186 = vector.broadcast %cst_83 : f32 to vector<5x128xf32>
    %187 = arith.addf %186, %185 : vector<5x128xf32>
    %188 = arith.divf %186, %187 : vector<5x128xf32>
    %189 = arith.mulf %181, %188 : vector<5x128xf32>
    %c0_84 = arith.constant 0 : index
    %c0_85 = arith.constant 0 : index
    %c0_86 = arith.constant 0 : index
    %190 = vector.load %arg16[%c0_84, %c0_85, %c0_86] : memref<2x128x32xf32, #tpu.memory_space<vmem>>, vector<1x128x32xf32>
    %191 = vector.shape_cast %190 : vector<1x128x32xf32> to vector<128x32xf32>
    %cst_87 = arith.constant dense<0.000000e+00> : vector<5x32xf32>
    %192 = tpu.matmul %189, %191, %cst_87 {dimension_numbers = #tpu.dot_dimension_numbers<[1], [0], [0], [1], [0, 0, 1, 1], [], []>} : vector<5x128xf32>, vector<128x32xf32>, vector<5x32xf32> -> vector<5x32xf32>
    %c0_88 = arith.constant 0 : index
    %c0_89 = arith.constant 0 : index
    %c0_90 = arith.constant 0 : index
    %193 = vector.load %arg17[%c0_88, %c0_89, %c0_90] : memref<2x1x32xf32, #tpu.memory_space<vmem>>, vector<1x1x32xf32>
    %194 = vector.shape_cast %193 : vector<1x1x32xf32> to vector<1x32xf32>
    %195 = vector.broadcast %194 : vector<1x32xf32> to vector<5x32xf32>
    %196 = arith.addf %192, %195 : vector<5x32xf32>
    %197 = arith.addf %150, %196 : vector<5x32xf32>
    %c1 = arith.constant 1 : index
    %c0_91 = arith.constant 0 : index
    %c0_92 = arith.constant 0 : index
    %198 = vector.load %arg6[%c1, %c0_91, %c0_92] : memref<2x1x32xf32, #tpu.memory_space<vmem>>, vector<1x1x32xf32>
    %199 = vector.shape_cast %198 : vector<1x1x32xf32> to vector<1x32xf32>
    %c1_93 = arith.constant 1 : index
    %c0_94 = arith.constant 0 : index
    %c0_95 = arith.constant 0 : index
    %200 = vector.load %arg7[%c1_93, %c0_94, %c0_95] : memref<2x1x32xf32, #tpu.memory_space<vmem>>, vector<1x1x32xf32>
    %201 = vector.shape_cast %200 : vector<1x1x32xf32> to vector<1x32xf32>
    %cst_96 = arith.constant dense<0.000000e+00> : vector<5xf32>
    %202 = vector.multi_reduction <add>, %197, %cst_96 [1] : vector<5x32xf32> to vector<5xf32>
    %203 = vector.shape_cast %202 : vector<5xf32> to vector<5x1xf32>
    %cst_97 = arith.constant 3.200000e+01 : f32
    %204 = vector.broadcast %cst_97 : f32 to vector<5x1xf32>
    %205 = arith.divf %203, %204 : vector<5x1xf32>
    %206 = vector.broadcast %205 : vector<5x1xf32> to vector<5x32xf32>
    %207 = arith.subf %197, %206 : vector<5x32xf32>
    %208 = arith.mulf %207, %207 : vector<5x32xf32>
    %cst_98 = arith.constant dense<0.000000e+00> : vector<5xf32>
    %209 = vector.multi_reduction <add>, %208, %cst_98 [1] : vector<5x32xf32> to vector<5xf32>
    %210 = vector.shape_cast %209 : vector<5xf32> to vector<5x1xf32>
    %cst_99 = arith.constant 3.200000e+01 : f32
    %211 = vector.broadcast %cst_99 : f32 to vector<5x1xf32>
    %212 = arith.divf %210, %211 : vector<5x1xf32>
    %cst_100 = arith.constant 9.99999974E-6 : f32
    %213 = vector.broadcast %cst_100 : f32 to vector<5x1xf32>
    %214 = arith.addf %212, %213 : vector<5x1xf32>
    %215 = math.rsqrt %214 : vector<5x1xf32>
    %216 = vector.broadcast %215 : vector<5x1xf32> to vector<5x32xf32>
    %217 = arith.mulf %207, %216 : vector<5x32xf32>
    %218 = vector.broadcast %199 : vector<1x32xf32> to vector<5x32xf32>
    %219 = arith.mulf %217, %218 : vector<5x32xf32>
    %220 = vector.broadcast %201 : vector<1x32xf32> to vector<5x32xf32>
    %221 = arith.addf %219, %220 : vector<5x32xf32>
    %c1_101 = arith.constant 1 : index
    %c0_102 = arith.constant 0 : index
    %c0_103 = arith.constant 0 : index
    %222 = vector.load %arg10[%c1_101, %c0_102, %c0_103] : memref<2x32x96xf32, #tpu.memory_space<vmem>>, vector<1x32x96xf32>
    %223 = vector.shape_cast %222 : vector<1x32x96xf32> to vector<32x96xf32>
    %cst_104 = arith.constant dense<0.000000e+00> : vector<5x96xf32>
    %224 = tpu.matmul %221, %223, %cst_104 {dimension_numbers = #tpu.dot_dimension_numbers<[1], [0], [0], [1], [0, 0, 1, 1], [], []>} : vector<5x32xf32>, vector<32x96xf32>, vector<5x96xf32> -> vector<5x96xf32>
    %c1_105 = arith.constant 1 : index
    %c0_106 = arith.constant 0 : index
    %c0_107 = arith.constant 0 : index
    %225 = vector.load %arg11[%c1_105, %c0_106, %c0_107] : memref<2x1x96xf32, #tpu.memory_space<vmem>>, vector<1x1x96xf32>
    %226 = vector.shape_cast %225 : vector<1x1x96xf32> to vector<1x96xf32>
    %227 = vector.broadcast %226 : vector<1x96xf32> to vector<5x96xf32>
    %228 = arith.addf %224, %227 : vector<5x96xf32>
    %c1_108 = arith.constant 1 : index
    %c0_109 = arith.constant 0 : index
    %c0_110 = arith.constant 0 : index
    %229 = vector.load %arg12[%c1_108, %c0_109, %c0_110] : memref<2x32x32xf32, #tpu.memory_space<vmem>>, vector<1x32x32xf32>
    %230 = vector.shape_cast %229 : vector<1x32x32xf32> to vector<32x32xf32>
    %cst_111 = arith.constant 0.000000e+00 : f32
    %231 = vector.broadcast %cst_111 : f32 to vector<5x32xf32>
    %232 = vector.extract_strided_slice %228 {offsets = [0, 0], sizes = [5, 8], strides = [1, 1]} : vector<5x96xf32> to vector<5x8xf32>
    %233 = vector.extract_strided_slice %228 {offsets = [0, 32], sizes = [5, 8], strides = [1, 1]} : vector<5x96xf32> to vector<5x8xf32>
    %234 = vector.extract_strided_slice %228 {offsets = [0, 64], sizes = [5, 8], strides = [1, 1]} : vector<5x96xf32> to vector<5x8xf32>
    %235 = tpu.transpose %233, [1, 0] : vector<5x8xf32> -> vector<8x5xf32>
    %cst_112 = arith.constant dense<0.000000e+00> : vector<5x5xf32>
    %236 = tpu.matmul %232, %235, %cst_112 {dimension_numbers = #tpu.dot_dimension_numbers<[1], [0], [0], [1], [0, 0, 1, 1], [], []>} : vector<5x8xf32>, vector<8x5xf32>, vector<5x5xf32> -> vector<5x5xf32>
    %cst_113 = arith.constant 0.353553385 : f32
    %237 = vector.broadcast %cst_113 : f32 to vector<5x5xf32>
    %238 = arith.mulf %236, %237 : vector<5x5xf32>
    %cst_114 = arith.constant dense<0xFF800000> : vector<5xf32>
    %239 = vector.multi_reduction <maximumf>, %238, %cst_114 [1] : vector<5x5xf32> to vector<5xf32>
    %240 = vector.shape_cast %239 : vector<5xf32> to vector<5x1xf32>
    %241 = vector.broadcast %240 : vector<5x1xf32> to vector<5x5xf32>
    %242 = arith.subf %238, %241 : vector<5x5xf32>
    %243 = math.exp %242 : vector<5x5xf32>
    %cst_115 = arith.constant dense<0.000000e+00> : vector<5xf32>
    %244 = vector.multi_reduction <add>, %243, %cst_115 [1] : vector<5x5xf32> to vector<5xf32>
    %245 = vector.shape_cast %244 : vector<5xf32> to vector<5x1xf32>
    %246 = tpu.reciprocal %245 {approx = true} : vector<5x1xf32> -> vector<5x1xf32>
    %247 = vector.broadcast %246 : vector<5x1xf32> to vector<5x5xf32>
    %248 = arith.mulf %243, %247 : vector<5x5xf32>
    %cst_116 = arith.constant dense<0.000000e+00> : vector<5x8xf32>
    %249 = tpu.matmul %248, %234, %cst_116 {dimension_numbers = #tpu.dot_dimension_numbers<[1], [0], [0], [1], [0, 0, 1, 1], [], []>} : vector<5x5xf32>, vector<5x8xf32>, vector<5x8xf32> -> vector<5x8xf32>
    %250 = vector.extract_strided_slice %230 {offsets = [0, 0], sizes = [8, 32], strides = [1, 1]} : vector<32x32xf32> to vector<8x32xf32>
    %cst_117 = arith.constant dense<0.000000e+00> : vector<5x32xf32>
    %251 = tpu.matmul %249, %250, %cst_117 {dimension_numbers = #tpu.dot_dimension_numbers<[1], [0], [0], [1], [0, 0, 1, 1], [], []>} : vector<5x8xf32>, vector<8x32xf32>, vector<5x32xf32> -> vector<5x32xf32>
    %252 = arith.addf %231, %251 : vector<5x32xf32>
    %253 = vector.extract_strided_slice %228 {offsets = [0, 8], sizes = [5, 8], strides = [1, 1]} : vector<5x96xf32> to vector<5x8xf32>
    %254 = vector.extract_strided_slice %228 {offsets = [0, 40], sizes = [5, 8], strides = [1, 1]} : vector<5x96xf32> to vector<5x8xf32>
    %255 = vector.extract_strided_slice %228 {offsets = [0, 72], sizes = [5, 8], strides = [1, 1]} : vector<5x96xf32> to vector<5x8xf32>
    %256 = tpu.transpose %254, [1, 0] : vector<5x8xf32> -> vector<8x5xf32>
    %cst_118 = arith.constant dense<0.000000e+00> : vector<5x5xf32>
    %257 = tpu.matmul %253, %256, %cst_118 {dimension_numbers = #tpu.dot_dimension_numbers<[1], [0], [0], [1], [0, 0, 1, 1], [], []>} : vector<5x8xf32>, vector<8x5xf32>, vector<5x5xf32> -> vector<5x5xf32>
    %cst_119 = arith.constant 0.353553385 : f32
    %258 = vector.broadcast %cst_119 : f32 to vector<5x5xf32>
    %259 = arith.mulf %257, %258 : vector<5x5xf32>
    %cst_120 = arith.constant dense<0xFF800000> : vector<5xf32>
    %260 = vector.multi_reduction <maximumf>, %259, %cst_120 [1] : vector<5x5xf32> to vector<5xf32>
    %261 = vector.shape_cast %260 : vector<5xf32> to vector<5x1xf32>
    %262 = vector.broadcast %261 : vector<5x1xf32> to vector<5x5xf32>
    %263 = arith.subf %259, %262 : vector<5x5xf32>
    %264 = math.exp %263 : vector<5x5xf32>
    %cst_121 = arith.constant dense<0.000000e+00> : vector<5xf32>
    %265 = vector.multi_reduction <add>, %264, %cst_121 [1] : vector<5x5xf32> to vector<5xf32>
    %266 = vector.shape_cast %265 : vector<5xf32> to vector<5x1xf32>
    %267 = tpu.reciprocal %266 {approx = true} : vector<5x1xf32> -> vector<5x1xf32>
    %268 = vector.broadcast %267 : vector<5x1xf32> to vector<5x5xf32>
    %269 = arith.mulf %264, %268 : vector<5x5xf32>
    %cst_122 = arith.constant dense<0.000000e+00> : vector<5x8xf32>
    %270 = tpu.matmul %269, %255, %cst_122 {dimension_numbers = #tpu.dot_dimension_numbers<[1], [0], [0], [1], [0, 0, 1, 1], [], []>} : vector<5x5xf32>, vector<5x8xf32>, vector<5x8xf32> -> vector<5x8xf32>
    %271 = vector.extract_strided_slice %230 {offsets = [8, 0], sizes = [8, 32], strides = [1, 1]} : vector<32x32xf32> to vector<8x32xf32>
    %cst_123 = arith.constant dense<0.000000e+00> : vector<5x32xf32>
    %272 = tpu.matmul %270, %271, %cst_123 {dimension_numbers = #tpu.dot_dimension_numbers<[1], [0], [0], [1], [0, 0, 1, 1], [], []>} : vector<5x8xf32>, vector<8x32xf32>, vector<5x32xf32> -> vector<5x32xf32>
    %273 = arith.addf %252, %272 : vector<5x32xf32>
    %274 = vector.extract_strided_slice %228 {offsets = [0, 16], sizes = [5, 8], strides = [1, 1]} : vector<5x96xf32> to vector<5x8xf32>
    %275 = vector.extract_strided_slice %228 {offsets = [0, 48], sizes = [5, 8], strides = [1, 1]} : vector<5x96xf32> to vector<5x8xf32>
    %276 = vector.extract_strided_slice %228 {offsets = [0, 80], sizes = [5, 8], strides = [1, 1]} : vector<5x96xf32> to vector<5x8xf32>
    %277 = tpu.transpose %275, [1, 0] : vector<5x8xf32> -> vector<8x5xf32>
    %cst_124 = arith.constant dense<0.000000e+00> : vector<5x5xf32>
    %278 = tpu.matmul %274, %277, %cst_124 {dimension_numbers = #tpu.dot_dimension_numbers<[1], [0], [0], [1], [0, 0, 1, 1], [], []>} : vector<5x8xf32>, vector<8x5xf32>, vector<5x5xf32> -> vector<5x5xf32>
    %cst_125 = arith.constant 0.353553385 : f32
    %279 = vector.broadcast %cst_125 : f32 to vector<5x5xf32>
    %280 = arith.mulf %278, %279 : vector<5x5xf32>
    %cst_126 = arith.constant dense<0xFF800000> : vector<5xf32>
    %281 = vector.multi_reduction <maximumf>, %280, %cst_126 [1] : vector<5x5xf32> to vector<5xf32>
    %282 = vector.shape_cast %281 : vector<5xf32> to vector<5x1xf32>
    %283 = vector.broadcast %282 : vector<5x1xf32> to vector<5x5xf32>
    %284 = arith.subf %280, %283 : vector<5x5xf32>
    %285 = math.exp %284 : vector<5x5xf32>
    %cst_127 = arith.constant dense<0.000000e+00> : vector<5xf32>
    %286 = vector.multi_reduction <add>, %285, %cst_127 [1] : vector<5x5xf32> to vector<5xf32>
    %287 = vector.shape_cast %286 : vector<5xf32> to vector<5x1xf32>
    %288 = tpu.reciprocal %287 {approx = true} : vector<5x1xf32> -> vector<5x1xf32>
    %289 = vector.broadcast %288 : vector<5x1xf32> to vector<5x5xf32>
    %290 = arith.mulf %285, %289 : vector<5x5xf32>
    %cst_128 = arith.constant dense<0.000000e+00> : vector<5x8xf32>
    %291 = tpu.matmul %290, %276, %cst_128 {dimension_numbers = #tpu.dot_dimension_numbers<[1], [0], [0], [1], [0, 0, 1, 1], [], []>} : vector<5x5xf32>, vector<5x8xf32>, vector<5x8xf32> -> vector<5x8xf32>
    %292 = vector.extract_strided_slice %230 {offsets = [16, 0], sizes = [8, 32], strides = [1, 1]} : vector<32x32xf32> to vector<8x32xf32>
    %cst_129 = arith.constant dense<0.000000e+00> : vector<5x32xf32>
    %293 = tpu.matmul %291, %292, %cst_129 {dimension_numbers = #tpu.dot_dimension_numbers<[1], [0], [0], [1], [0, 0, 1, 1], [], []>} : vector<5x8xf32>, vector<8x32xf32>, vector<5x32xf32> -> vector<5x32xf32>
    %294 = arith.addf %273, %293 : vector<5x32xf32>
    %295 = vector.extract_strided_slice %228 {offsets = [0, 24], sizes = [5, 8], strides = [1, 1]} : vector<5x96xf32> to vector<5x8xf32>
    %296 = vector.extract_strided_slice %228 {offsets = [0, 56], sizes = [5, 8], strides = [1, 1]} : vector<5x96xf32> to vector<5x8xf32>
    %297 = vector.extract_strided_slice %228 {offsets = [0, 88], sizes = [5, 8], strides = [1, 1]} : vector<5x96xf32> to vector<5x8xf32>
    %298 = tpu.transpose %296, [1, 0] : vector<5x8xf32> -> vector<8x5xf32>
    %cst_130 = arith.constant dense<0.000000e+00> : vector<5x5xf32>
    %299 = tpu.matmul %295, %298, %cst_130 {dimension_numbers = #tpu.dot_dimension_numbers<[1], [0], [0], [1], [0, 0, 1, 1], [], []>} : vector<5x8xf32>, vector<8x5xf32>, vector<5x5xf32> -> vector<5x5xf32>
    %cst_131 = arith.constant 0.353553385 : f32
    %300 = vector.broadcast %cst_131 : f32 to vector<5x5xf32>
    %301 = arith.mulf %299, %300 : vector<5x5xf32>
    %cst_132 = arith.constant dense<0xFF800000> : vector<5xf32>
    %302 = vector.multi_reduction <maximumf>, %301, %cst_132 [1] : vector<5x5xf32> to vector<5xf32>
    %303 = vector.shape_cast %302 : vector<5xf32> to vector<5x1xf32>
    %304 = vector.broadcast %303 : vector<5x1xf32> to vector<5x5xf32>
    %305 = arith.subf %301, %304 : vector<5x5xf32>
    %306 = math.exp %305 : vector<5x5xf32>
    %cst_133 = arith.constant dense<0.000000e+00> : vector<5xf32>
    %307 = vector.multi_reduction <add>, %306, %cst_133 [1] : vector<5x5xf32> to vector<5xf32>
    %308 = vector.shape_cast %307 : vector<5xf32> to vector<5x1xf32>
    %309 = tpu.reciprocal %308 {approx = true} : vector<5x1xf32> -> vector<5x1xf32>
    %310 = vector.broadcast %309 : vector<5x1xf32> to vector<5x5xf32>
    %311 = arith.mulf %306, %310 : vector<5x5xf32>
    %cst_134 = arith.constant dense<0.000000e+00> : vector<5x8xf32>
    %312 = tpu.matmul %311, %297, %cst_134 {dimension_numbers = #tpu.dot_dimension_numbers<[1], [0], [0], [1], [0, 0, 1, 1], [], []>} : vector<5x5xf32>, vector<5x8xf32>, vector<5x8xf32> -> vector<5x8xf32>
    %313 = vector.extract_strided_slice %230 {offsets = [24, 0], sizes = [8, 32], strides = [1, 1]} : vector<32x32xf32> to vector<8x32xf32>
    %cst_135 = arith.constant dense<0.000000e+00> : vector<5x32xf32>
    %314 = tpu.matmul %312, %313, %cst_135 {dimension_numbers = #tpu.dot_dimension_numbers<[1], [0], [0], [1], [0, 0, 1, 1], [], []>} : vector<5x8xf32>, vector<8x32xf32>, vector<5x32xf32> -> vector<5x32xf32>
    %315 = arith.addf %294, %314 : vector<5x32xf32>
    %316 = arith.addf %197, %315 : vector<5x32xf32>
    %c1_136 = arith.constant 1 : index
    %c0_137 = arith.constant 0 : index
    %c0_138 = arith.constant 0 : index
    %317 = vector.load %arg13[%c1_136, %c0_137, %c0_138] : memref<2x1x32xf32, #tpu.memory_space<vmem>>, vector<1x1x32xf32>
    %318 = vector.shape_cast %317 : vector<1x1x32xf32> to vector<1x32xf32>
    %319 = vector.broadcast %318 : vector<1x32xf32> to vector<5x32xf32>
    %320 = arith.addf %316, %319 : vector<5x32xf32>
    %c1_139 = arith.constant 1 : index
    %c0_140 = arith.constant 0 : index
    %c0_141 = arith.constant 0 : index
    %321 = vector.load %arg8[%c1_139, %c0_140, %c0_141] : memref<2x1x32xf32, #tpu.memory_space<vmem>>, vector<1x1x32xf32>
    %322 = vector.shape_cast %321 : vector<1x1x32xf32> to vector<1x32xf32>
    %c1_142 = arith.constant 1 : index
    %c0_143 = arith.constant 0 : index
    %c0_144 = arith.constant 0 : index
    %323 = vector.load %arg9[%c1_142, %c0_143, %c0_144] : memref<2x1x32xf32, #tpu.memory_space<vmem>>, vector<1x1x32xf32>
    %324 = vector.shape_cast %323 : vector<1x1x32xf32> to vector<1x32xf32>
    %cst_145 = arith.constant dense<0.000000e+00> : vector<5xf32>
    %325 = vector.multi_reduction <add>, %320, %cst_145 [1] : vector<5x32xf32> to vector<5xf32>
    %326 = vector.shape_cast %325 : vector<5xf32> to vector<5x1xf32>
    %cst_146 = arith.constant 3.200000e+01 : f32
    %327 = vector.broadcast %cst_146 : f32 to vector<5x1xf32>
    %328 = arith.divf %326, %327 : vector<5x1xf32>
    %329 = vector.broadcast %328 : vector<5x1xf32> to vector<5x32xf32>
    %330 = arith.subf %320, %329 : vector<5x32xf32>
    %331 = arith.mulf %330, %330 : vector<5x32xf32>
    %cst_147 = arith.constant dense<0.000000e+00> : vector<5xf32>
    %332 = vector.multi_reduction <add>, %331, %cst_147 [1] : vector<5x32xf32> to vector<5xf32>
    %333 = vector.shape_cast %332 : vector<5xf32> to vector<5x1xf32>
    %cst_148 = arith.constant 3.200000e+01 : f32
    %334 = vector.broadcast %cst_148 : f32 to vector<5x1xf32>
    %335 = arith.divf %333, %334 : vector<5x1xf32>
    %cst_149 = arith.constant 9.99999974E-6 : f32
    %336 = vector.broadcast %cst_149 : f32 to vector<5x1xf32>
    %337 = arith.addf %335, %336 : vector<5x1xf32>
    %338 = math.rsqrt %337 : vector<5x1xf32>
    %339 = vector.broadcast %338 : vector<5x1xf32> to vector<5x32xf32>
    %340 = arith.mulf %330, %339 : vector<5x32xf32>
    %341 = vector.broadcast %322 : vector<1x32xf32> to vector<5x32xf32>
    %342 = arith.mulf %340, %341 : vector<5x32xf32>
    %343 = vector.broadcast %324 : vector<1x32xf32> to vector<5x32xf32>
    %344 = arith.addf %342, %343 : vector<5x32xf32>
    %c1_150 = arith.constant 1 : index
    %c0_151 = arith.constant 0 : index
    %c0_152 = arith.constant 0 : index
    %345 = vector.load %arg14[%c1_150, %c0_151, %c0_152] : memref<2x32x128xf32, #tpu.memory_space<vmem>>, vector<1x32x128xf32>
    %346 = vector.shape_cast %345 : vector<1x32x128xf32> to vector<32x128xf32>
    %cst_153 = arith.constant dense<0.000000e+00> : vector<5x128xf32>
    %347 = tpu.matmul %344, %346, %cst_153 {dimension_numbers = #tpu.dot_dimension_numbers<[1], [0], [0], [1], [0, 0, 1, 1], [], []>} : vector<5x32xf32>, vector<32x128xf32>, vector<5x128xf32> -> vector<5x128xf32>
    %c1_154 = arith.constant 1 : index
    %c0_155 = arith.constant 0 : index
    %c0_156 = arith.constant 0 : index
    %348 = vector.load %arg15[%c1_154, %c0_155, %c0_156] : memref<2x1x128xf32, #tpu.memory_space<vmem>>, vector<1x1x128xf32>
    %349 = vector.shape_cast %348 : vector<1x1x128xf32> to vector<1x128xf32>
    %350 = vector.broadcast %349 : vector<1x128xf32> to vector<5x128xf32>
    %351 = arith.addf %347, %350 : vector<5x128xf32>
    %cst_157 = arith.constant 1.702000e+00 : f32
    %352 = vector.broadcast %cst_157 : f32 to vector<5x128xf32>
    %353 = arith.mulf %352, %351 : vector<5x128xf32>
    %354 = arith.negf %353 : vector<5x128xf32>
    %355 = math.exp %354 : vector<5x128xf32>
    %cst_158 = arith.constant 1.000000e+00 : f32
    %356 = vector.broadcast %cst_158 : f32 to vector<5x128xf32>
    %357 = arith.addf %356, %355 : vector<5x128xf32>
    %358 = arith.divf %356, %357 : vector<5x128xf32>
    %359 = arith.mulf %351, %358 : vector<5x128xf32>
    %c1_159 = arith.constant 1 : index
    %c0_160 = arith.constant 0 : index
    %c0_161 = arith.constant 0 : index
    %360 = vector.load %arg16[%c1_159, %c0_160, %c0_161] : memref<2x128x32xf32, #tpu.memory_space<vmem>>, vector<1x128x32xf32>
    %361 = vector.shape_cast %360 : vector<1x128x32xf32> to vector<128x32xf32>
    %cst_162 = arith.constant dense<0.000000e+00> : vector<5x32xf32>
    %362 = tpu.matmul %359, %361, %cst_162 {dimension_numbers = #tpu.dot_dimension_numbers<[1], [0], [0], [1], [0, 0, 1, 1], [], []>} : vector<5x128xf32>, vector<128x32xf32>, vector<5x32xf32> -> vector<5x32xf32>
    %c1_163 = arith.constant 1 : index
    %c0_164 = arith.constant 0 : index
    %c0_165 = arith.constant 0 : index
    %363 = vector.load %arg17[%c1_163, %c0_164, %c0_165] : memref<2x1x32xf32, #tpu.memory_space<vmem>>, vector<1x1x32xf32>
    %364 = vector.shape_cast %363 : vector<1x1x32xf32> to vector<1x32xf32>
    %365 = vector.broadcast %364 : vector<1x32xf32> to vector<5x32xf32>
    %366 = arith.addf %362, %365 : vector<5x32xf32>
    %367 = arith.addf %320, %366 : vector<5x32xf32>
    %368 = vector.extract_strided_slice %367 {offsets = [0, 0], sizes = [1, 32], strides = [1, 1]} : vector<5x32xf32> to vector<1x32xf32>
    %c0_166 = arith.constant 0 : index
    %c0_167 = arith.constant 0 : index
    %369 = vector.load %arg18[%c0_166, %c0_167] : memref<1x32xf32, #tpu.memory_space<vmem>>, vector<1x32xf32>
    %c0_168 = arith.constant 0 : index
    %c0_169 = arith.constant 0 : index
    %370 = vector.load %arg19[%c0_168, %c0_169] : memref<1x32xf32, #tpu.memory_space<vmem>>, vector<1x32xf32>
    %cst_170 = arith.constant dense<0.000000e+00> : vector<1xf32>
    %371 = vector.multi_reduction <add>, %368, %cst_170 [1] : vector<1x32xf32> to vector<1xf32>
    %372 = vector.shape_cast %371 : vector<1xf32> to vector<1x1xf32>
    %cst_171 = arith.constant 3.200000e+01 : f32
    %373 = vector.broadcast %cst_171 : f32 to vector<1x1xf32>
    %374 = arith.divf %372, %373 : vector<1x1xf32>
    %375 = vector.broadcast %374 : vector<1x1xf32> to vector<1x32xf32>
    %376 = arith.subf %368, %375 : vector<1x32xf32>
    %377 = arith.mulf %376, %376 : vector<1x32xf32>
    %cst_172 = arith.constant dense<0.000000e+00> : vector<1xf32>
    %378 = vector.multi_reduction <add>, %377, %cst_172 [1] : vector<1x32xf32> to vector<1xf32>
    %379 = vector.shape_cast %378 : vector<1xf32> to vector<1x1xf32>
    %cst_173 = arith.constant 3.200000e+01 : f32
    %380 = vector.broadcast %cst_173 : f32 to vector<1x1xf32>
    %381 = arith.divf %379, %380 : vector<1x1xf32>
    %cst_174 = arith.constant 9.99999974E-6 : f32
    %382 = vector.broadcast %cst_174 : f32 to vector<1x1xf32>
    %383 = arith.addf %381, %382 : vector<1x1xf32>
    %384 = math.rsqrt %383 : vector<1x1xf32>
    %385 = vector.broadcast %384 : vector<1x1xf32> to vector<1x32xf32>
    %386 = arith.mulf %376, %385 : vector<1x32xf32>
    %387 = arith.mulf %386, %369 : vector<1x32xf32>
    %388 = arith.addf %387, %370 : vector<1x32xf32>
    %c0_175 = arith.constant 0 : index
    %c0_176 = arith.constant 0 : index
    %389 = vector.load %arg20[%c0_175, %c0_176] : memref<32x10xf32, #tpu.memory_space<vmem>>, vector<32x10xf32>
    %cst_177 = arith.constant dense<0.000000e+00> : vector<1x10xf32>
    %390 = tpu.matmul %388, %389, %cst_177 {dimension_numbers = #tpu.dot_dimension_numbers<[1], [0], [0], [1], [0, 0, 1, 1], [], []>} : vector<1x32xf32>, vector<32x10xf32>, vector<1x10xf32> -> vector<1x10xf32>
    %c0_178 = arith.constant 0 : index
    %c0_179 = arith.constant 0 : index
    %391 = vector.load %arg21[%c0_178, %c0_179] : memref<1x10xf32, #tpu.memory_space<vmem>>, vector<1x10xf32>
    %392 = arith.addf %390, %391 : vector<1x10xf32>
    %c0_180 = arith.constant 0 : index
    %c0_181 = arith.constant 0 : index
    %c0_182 = arith.constant 0 : index
    %393 = vector.load %arg22[%c0_180, %c0_181, %c0_182] : memref<1x1x10xf32, #tpu.memory_space<vmem>>, vector<1x1x10xf32>
    %394 = vector.shape_cast %393 : vector<1x1x10xf32> to vector<1x10xf32>
    %395 = vector.shape_cast %392 : vector<1x10xf32> to vector<1x1x10xf32>
    tpu.vector_store %arg22[%c0_180, %c0_181, %c0_182], %395 {strides = array<i32>} : memref<1x1x10xf32, #tpu.memory_space<vmem>>, vector<1x1x10xf32>,
    return
  }
  func.func @transform_0(%arg0: i32) -> (i32, i32, i32) {
    %c0_i32 = arith.constant 0 : i32
    %c0_i32_0 = arith.constant 0 : i32
    %c0_i32_1 = arith.constant 0 : i32
    return %arg0, %c0_i32, %c0_i32_0 : i32, i32, i32
  }
  func.func @transform_1(%arg0: i32) -> (i32, i32) {
    %c0_i32 = arith.constant 0 : i32
    %c0_i32_0 = arith.constant 0 : i32
    %c0_i32_1 = arith.constant 0 : i32
    return %c0_i32, %c0_i32_0 : i32, i32
  }
  func.func @transform_2(%arg0: i32) -> (i32, i32) {
    %c0_i32 = arith.constant 0 : i32
    %c0_i32_0 = arith.constant 0 : i32
    %c0_i32_1 = arith.constant 0 : i32
    return %c0_i32, %c0_i32_0 : i32, i32
  }
  func.func @transform_3(%arg0: i32) -> (i32, i32) {
    %c0_i32 = arith.constant 0 : i32
    %c0_i32_0 = arith.constant 0 : i32
    %c0_i32_1 = arith.constant 0 : i32
    return %c0_i32, %c0_i32_0 : i32, i32
  }
  func.func @transform_4(%arg0: i32) -> (i32, i32) {
    %c0_i32 = arith.constant 0 : i32
    %c0_i32_0 = arith.constant 0 : i32
    %c0_i32_1 = arith.constant 0 : i32
    return %c0_i32, %c0_i32_0 : i32, i32
  }
  func.func @transform_5(%arg0: i32) -> (i32, i32, i32) {
    %c0_i32 = arith.constant 0 : i32
    %c0_i32_0 = arith.constant 0 : i32
    %c0_i32_1 = arith.constant 0 : i32
    %c0_i32_2 = arith.constant 0 : i32
    return %c0_i32, %c0_i32_0, %c0_i32_1 : i32, i32, i32
  }
  func.func @transform_6(%arg0: i32) -> (i32, i32, i32) {
    %c0_i32 = arith.constant 0 : i32
    %c0_i32_0 = arith.constant 0 : i32
    %c0_i32_1 = arith.constant 0 : i32
    %c0_i32_2 = arith.constant 0 : i32
    return %c0_i32, %c0_i32_0, %c0_i32_1 : i32, i32, i32
  }
  func.func @transform_7(%arg0: i32) -> (i32, i32, i32) {
    %c0_i32 = arith.constant 0 : i32
    %c0_i32_0 = arith.constant 0 : i32
    %c0_i32_1 = arith.constant 0 : i32
    %c0_i32_2 = arith.constant 0 : i32
    return %c0_i32, %c0_i32_0, %c0_i32_1 : i32, i32, i32
  }
  func.func @transform_8(%arg0: i32) -> (i32, i32, i32) {
    %c0_i32 = arith.constant 0 : i32
    %c0_i32_0 = arith.constant 0 : i32
    %c0_i32_1 = arith.constant 0 : i32
    %c0_i32_2 = arith.constant 0 : i32
    return %c0_i32, %c0_i32_0, %c0_i32_1 : i32, i32, i32
  }
  func.func @transform_9(%arg0: i32) -> (i32, i32, i32) {
    %c0_i32 = arith.constant 0 : i32
    %c0_i32_0 = arith.constant 0 : i32
    %c0_i32_1 = arith.constant 0 : i32
    %c0_i32_2 = arith.constant 0 : i32
    return %c0_i32, %c0_i32_0, %c0_i32_1 : i32, i32, i32
  }
  func.func @transform_10(%arg0: i32) -> (i32, i32, i32) {
    %c0_i32 = arith.constant 0 : i32
    %c0_i32_0 = arith.constant 0 : i32
    %c0_i32_1 = arith.constant 0 : i32
    %c0_i32_2 = arith.constant 0 : i32
    return %c0_i32, %c0_i32_0, %c0_i32_1 : i32, i32, i32
  }
  func.func @transform_11(%arg0: i32) -> (i32, i32, i32) {
    %c0_i32 = arith.constant 0 : i32
    %c0_i32_0 = arith.constant 0 : i32
    %c0_i32_1 = arith.constant 0 : i32
    %c0_i32_2 = arith.constant 0 : i32
    return %c0_i32, %c0_i32_0, %c0_i32_1 : i32, i32, i32
  }
  func.func @transform_12(%arg0: i32) -> (i32, i32, i32) {
    %c0_i32 = arith.constant 0 : i32
    %c0_i32_0 = arith.constant 0 : i32
    %c0_i32_1 = arith.constant 0 : i32
    %c0_i32_2 = arith.constant 0 : i32
    return %c0_i32, %c0_i32_0, %c0_i32_1 : i32, i32, i32
  }
  func.func @transform_13(%arg0: i32) -> (i32, i32, i32) {
    %c0_i32 = arith.constant 0 : i32
    %c0_i32_0 = arith.constant 0 : i32
    %c0_i32_1 = arith.constant 0 : i32
    %c0_i32_2 = arith.constant 0 : i32
    return %c0_i32, %c0_i32_0, %c0_i32_1 : i32, i32, i32
  }
  func.func @transform_14(%arg0: i32) -> (i32, i32, i32) {
    %c0_i32 = arith.constant 0 : i32
    %c0_i32_0 = arith.constant 0 : i32
    %c0_i32_1 = arith.constant 0 : i32
    %c0_i32_2 = arith.constant 0 : i32
    return %c0_i32, %c0_i32_0, %c0_i32_1 : i32, i32, i32
  }
  func.func @transform_15(%arg0: i32) -> (i32, i32, i32) {
    %c0_i32 = arith.constant 0 : i32
    %c0_i32_0 = arith.constant 0 : i32
    %c0_i32_1 = arith.constant 0 : i32
    %c0_i32_2 = arith.constant 0 : i32
    return %c0_i32, %c0_i32_0, %c0_i32_1 : i32, i32, i32
  }
  func.func @transform_16(%arg0: i32) -> (i32, i32, i32) {
    %c0_i32 = arith.constant 0 : i32
    %c0_i32_0 = arith.constant 0 : i32
    %c0_i32_1 = arith.constant 0 : i32
    %c0_i32_2 = arith.constant 0 : i32
    return %c0_i32, %c0_i32_0, %c0_i32_1 : i32, i32, i32
  }
  func.func @transform_17(%arg0: i32) -> (i32, i32) {
    %c0_i32 = arith.constant 0 : i32
    %c0_i32_0 = arith.constant 0 : i32
    %c0_i32_1 = arith.constant 0 : i32
    return %c0_i32, %c0_i32_0 : i32, i32
  }
  func.func @transform_18(%arg0: i32) -> (i32, i32) {
    %c0_i32 = arith.constant 0 : i32
    %c0_i32_0 = arith.constant 0 : i32
    %c0_i32_1 = arith.constant 0 : i32
    return %c0_i32, %c0_i32_0 : i32, i32
  }
  func.func @transform_19(%arg0: i32) -> (i32, i32) {
    %c0_i32 = arith.constant 0 : i32
    %c0_i32_0 = arith.constant 0 : i32
    %c0_i32_1 = arith.constant 0 : i32
    return %c0_i32, %c0_i32_0 : i32, i32
  }
  func.func @transform_20(%arg0: i32) -> (i32, i32) {
    %c0_i32 = arith.constant 0 : i32
    %c0_i32_0 = arith.constant 0 : i32
    %c0_i32_1 = arith.constant 0 : i32
    return %c0_i32, %c0_i32_0 : i32, i32
  }
  func.func @transform_21(%arg0: i32) -> (i32, i32, i32) {
    %c0_i32 = arith.constant 0 : i32
    %c0_i32_0 = arith.constant 0 : i32
    %c0_i32_1 = arith.constant 0 : i32
    return %arg0, %c0_i32, %c0_i32_0 : i32, i32, i32
  }
}

</mosaic_0001>

<bundles_post_ra>
// kernel: clip_image_encoder_forward.1
= control target key start
LH: loop header
LB: loop body
LE: loop exit
PB: predicated region body
PF: predicated region fallthrough
CT: control target
= control target key end

     0   :  { %s2985_s0 = inlined_call_operand.vmem [shape: f32[2,5,192], index: 0, kind: input, shape index: {}]   ;;  %s2986_s1 = inlined_call_operand.vmem [shape: f32[192,32], index: 1, kind: input, shape index: {}]   ;;  %s2987_s2 = inlined_call_operand.vmem [shape: f32[5,32], index: 2, kind: input, shape index: {}]   ;;  %s2988_s3 = inlined_call_operand.vmem [shape: f32[1,32], index: 3, kind: input, shape index: {}]   ;;  %s2989_s4 = inlined_call_operand.vmem [shape: f32[1,32], index: 4, kind: input, shape index: {}]   ;;  %s2990_s5 = inlined_call_operand.vmem [shape: f32[2,1,32], index: 5, kind: input, shape index: {}]   ;;  %s2991_s6 = inlined_call_operand.vmem [shape: f32[2,1,32], index: 6, kind: input, shape index: {}]   ;;  %s2992_s7 = inlined_call_operand.vmem [shape: f32[2,1,32], index: 7, kind: input, shape index: {}]   ;;  %s2993_s8 = inlined_call_operand.vmem [shape: f32[2,1,32], index: 8, kind: input, shape index: {}]   ;;  %s2994_s9 = inlined_call_operand.vmem [shape: f32[2,32,96], index: 9, kind: input, shape index: {}]   ;;  %s2995_s10 = inlined_call_operand.vmem [shape: f32[2,1,96], index: 10, kind: input, shape index: {}]   ;;  %s2996_s11 = inlined_call_operand.vmem [shape: f32[2,32,32], index: 11, kind: input, shape index: {}]   ;;  %s2997_s12 = inlined_call_operand.vmem [shape: f32[2,1,32], index: 12, kind: input, shape index: {}]   ;;  %s2998_s13 = inlined_call_operand.vmem [shape: f32[2,32,128], index: 13, kind: input, shape index: {}]   ;;  %s2999_s14 = inlined_call_operand.vmem [shape: f32[2,1,128], index: 14, kind: input, shape index: {}]   ;;  %s3000_s15 = inlined_call_operand.vmem [shape: f32[2,128,32], index: 15, kind: input, shape index: {}]   ;;  %s3001_s16 = inlined_call_operand.vmem [shape: f32[2,1,32], index: 16, kind: input, shape index: {}]   ;;  %s3002_s17 = inlined_call_operand.vmem [shape: f32[1,32], index: 17, kind: input, shape index: {}]   ;;  %s3003_s18 = inlined_call_operand.vmem [shape: f32[1,32], index: 18, kind: input, shape index: {}]   ;;  %s3004_s19 = inlined_call_operand.vmem [shape: f32[32,10], index: 19, kind: input, shape index: {}]   ;;  %s3005_s20 = inlined_call_operand.vmem [shape: f32[1,10], index: 20, kind: input, shape index: {}]   ;;  %s3006_s21 = inlined_call_operand.hbm [shape: f32[2,1,10], index: 21, kind: output, shape index: {}]  }
   0x1   :  { %3026 = sst [smem:[#allocation12_spill]] %s2985_s0 }
   0x2   :  { %3027 = sst [smem:[#allocation13_spill]] %s2986_s1 }
   0x3   :  { %3028 = sst [smem:[#allocation14_spill]] %s2987_s2 }
   0x4   :  { %3029 = sst [smem:[#allocation15_spill]] %s2988_s3 }
   0x5   :  { %3030 = sst [smem:[#allocation16_spill]] %s2989_s4 }
   0x6   :  { %3031 = sst [smem:[#allocation17_spill]] %s2990_s5 }
   0x7   :  { %3032 = sst [smem:[#allocation18_spill]] %s2991_s6 }
   0x8   :  { %3033 = sst [smem:[#allocation19_spill]] %s2992_s7 }
   0x9   :  { %3034 = sst [smem:[#allocation20_spill]] %s3005_s20 }
   0xa   :  { %26 = vsyncpa [#allocation3], 0 }
   0xb   :  { %28 = vsyncpa [#allocation3 + $0x1], 0  ;;  %s2427_s2 = smov 0   ;;  %s2429_s25 = smov 0  }
   0xc   :  { %s2431_s26 = smov 0   ;;  %s2433_s27 = smov 0  }
   0xd LB: > { %3035 = sst [smem:[#allocation5_spill]] %s2291_s2  ;;  %s2448_s3 = sadd.s32 4294967295, %s2303_s27   ;;  %s2303_s27 = sphi %s2433_s27, %s3066_s27   ;;  %s2299_s26 = sphi %s2431_s26, %s3068_s26   ;;  %s2295_s25 = sphi %s2429_s25, %s3070_s25   ;;  %s2291_s2 = sphi %s2427_s2, %s3069_s2  }
   0xe   : > { %3036 = sst [smem:[#allocation6_spill]] %s2299_s26  ;;  %s2025_s28 = sadd.s32 4294967294, %s2303_s27  }
   0xf   : > { %3037 = sst [smem:[#allocation7_spill]] %s2303_s27  ;;  %s2452_s29 = sadd.s32 1, %s2303_s27  }
  0x10   : > { %3038 = sst [smem:[#allocation8_spill]] %s2452_s29  ;;  %s487_s0 = sadd.s32 1, %s2299_s26 }
  0x11   : > { %s484_s4 = ssub.s32 %s2303_s27, %s2452_s29  ;;  %p497_p0 = scmp.ne.s32.totalorder %s2299_s26, %s2295_s25 }
  0x12   : > { %p485_p1 = scmp.eq.s32.totalorder %s484_s4, 0  ;;  %p498_p2 = scmp.eq.s32.totalorder %s2448_s3, 1 }
  0x13   : > { %p503_p3 = scmp.ne.s32.totalorder %s2295_s25, %s2291_s2  ;;  %p504_p4 = scmp.eq.s32.totalorder %s2025_s28, 1 }
  0x14   : > { %s2463_s30 = scalar_select %p485_p1, %s2299_s26, %s487_s0  }
  0x15   : > { %p2465_p5 = por %p498_p2, %p497_p0  ;;  %p2469_p6 = por %p504_p4, %p503_p3 }
  0x16   : > { %3039 = sst [smem:[#allocation9_spill]] %s2463_s30  ;;  %p2028_p7 = scmp.ge.s32.totalorder %s2303_s27, 1 }
  0x17   : > { %s3040_s5 = scalar_select %p2465_p5, 1, 0 }
  0x18   : > { %s3042_s22 = scalar_select %p2469_p6, 1, 0 }
  0x19   : > { %3041 = sst [smem:[#allocation10_spill]] %s3040_s5  ;;  %p590_p8 = scmp.lt.s32.totalorder %s2303_s27, 3 }
  0x1a   : > { %3043 = sst [smem:[#allocation11_spill]] %s3042_s22 }
  0x1b   : > { %p591_p9 = pnand %p2028_p7, %p590_p8 }
  0x1c   : > { %s3044_s24 = sld [smem:[#allocation13_spill]] (!%p591_p9)  ;;  %p649_p10 = scmp.lt.s32.totalorder (!%p591_p9), %s2448_s3, 1 }
  0x1d   : > { %594 = sbr.rel (%p591_p9) target bundleno = 5181 (0x143d), region = 104  ;;  %s3045_s26 = sld [smem:[#allocation12_spill]] (!%p591_p9) }
  0x1e   : > { %s3046_s2 = sld [smem:[#allocation14_spill]] (!%p591_p9)  ;;  %s2306_s5 = smov (!%p591_p9), 120  }
  0x1f   : > { %s3047_s22 = sld [smem:[#allocation15_spill]] (!%p591_p9)  ;;  %s3025_s29 = smov (!%p591_p9), 96  }
  0x20   : > { %s3049_s28 = sld [smem:[#allocation17_spill]] (!%p591_p9)  ;;  %s3017_s23 = smov (!%p591_p9), 64  }
  0x21   : > { %s3050_s6 = sld [smem:[#allocation18_spill]] (!%p591_p9)  ;;  %s2309_s1 = smov (!%p591_p9), 88  }
  0x22   : > { %v671_v0 = vld [vmem:[%s3044_s24 + $0x78] sm:$0xff]  ;;  %v670_v1 = vld [vmem:[%s3044_s24 + $0x70] sm:$0xff]  ;;  %v669_v2 = vld [vmem:[%s3044_s24 + $0x68] sm:$0xff]  ;;  %s650_s30 = scalar_select %p649_p10, %s2448_s3, 1  ;;  %vm681_vm0 = vcmask 523264   ;;  %vm727_vm1 = vcmask 258048  }
  0x23   : > { %685 = vmatpush.msra.mxu0 %v671_v0  ;;  %v679_v3 = vld [vmem:[%s3044_s24 + $0xb8] sm:$0xff]  ;;  %v678_v4 = vld [vmem:[%s3044_s24 + $0xb0] sm:$0xff]  ;;  %v668_v5 = vld [vmem:[%s3044_s24 + $0x60] sm:$0xff]  ;;  %v2305_v32 = vmov 32.0   ;;  %vm805_vm9 = vcmask 261120   ;;  %vm836_vm10 = vcmask 64512  }
  0x24   : > { %713 = vmatpush.msra.mxu3 %v679_v3  ;;  %v677_v6 = vld [vmem:[%s3044_s24 + $0xa8] sm:$0xff]  ;;  %v667_v7 = vld [vmem:[%s3044_s24 + $0x58] sm:$0xff]  ;;  %v676_v8 = vld [vmem:[%s3044_s24 + $0xa0] sm:$0xff]  ;;  %s2117_s27 = sshll.u32 %s650_s30, 4  ;;  %2187 = vrcp.f32 %v2305_v32  ;;  %s3048_s30 = sld [smem:[#allocation16_spill]]  ;;  %vm880_vm11 = vcmask 1044480  }
  0x25   : > { %686 = vmatpush.msra.mxu0 %v670_v1  ;;  %v666_v9 = vld [vmem:[%s3044_s24 + $0x50] sm:$0xff]  ;;  %v665_v10 = vld [vmem:[%s3044_s24 + $0x48] sm:$0xff]  ;;  %v675_v11 = vld [vmem:[%s3044_s24 + $0x98] sm:$0xff]  ;;  %s653_s20 = scalar_lea.vmem %s3045_s26, %s2117_s27  ;;  %s3022_s27 = smov 104   ;;  %vm862_vm12 = vcmask 36864   ;;  %vm876_vm13 = vcmask 39936  }
  0x26   : > { %714 = vmatpush.msra.mxu3 %v678_v4  ;;  %v674_v12 = vld [vmem:[%s3044_s24 + $0x90] sm:$0xff]  ;;  %v664_v13 = vld [vmem:[%s3044_s24 + $0x40] sm:$0xff]  ;;  %v673_v14 = vld [vmem:[%s3044_s24 + $0x88] sm:$0xff]  ;;  %s3024_s0 = smov 56   ;;  %s3051_s7 = sld [smem:[#allocation19_spill]] }
  0x27   : > { %687 = vmatpush.msra.mxu0 %v669_v2  ;;  %v663_v15 = vld [vmem:[%s3044_s24 + $0x38] sm:$0xff]  ;;  %v672_v16 = vld [vmem:[%s3044_s24 + $0x80] sm:$0xff]  ;;  %v655_v17 = vld [vmem:[%s653_s20 + $0x8] sm:$0x1f]  ;;  %s3054_s4 = smov 112   ;;  %s3055_s26 = smov 104  }
  0x28   : > { %715 = vmatpush.msra.mxu3 %v677_v6  ;;  %v662_v18 = vld [vmem:[%s3044_s24 + $0x30] sm:$0xff]  ;;  %v661_v19 = vld [vmem:[%s3044_s24 + $0x28] sm:$0xff]  ;;  %v660_v20 = vld [vmem:[%s3044_s24 + $0x20] sm:$0xff] }
  0x29   : > { %688 = vmatpush.msra.mxu0 %v668_v5  ;;  %v659_v21 = vld [vmem:[%s3044_s24 + $0x18] sm:$0xff]  ;;  %v658_v22 = vld [vmem:[%s3044_s24 + $0x10] sm:$0xff]  ;;  %v657_v23 = vld [vmem:[%s3044_s24 + $0x8] sm:$0xff] }
  0x2a   : > { %716 = vmatpush.msra.mxu3 %v676_v8  ;;  %v656_v24 = vld [vmem:[%s3044_s24] sm:$0xff]  ;;  %v2188_v33 = vpop.eup %2187  ;;  %v800_v1 = vld [vmem:[%s2994_s9 + $0x18] sm:$0xff]  ;;  %v799_v2 = vld [vmem:[%s2994_s9 + $0x10] sm:$0xff] }
  0x2b   : > { %689 = vmatpush.msra.mxu0 %v667_v7  ;;  %v654_v25 = vld [vmem:[%s653_s20] sm:$0x1f]  ;;  %v732_v34 = vmul.f32 32.0, %v2188_v33  ;;  %vm736_vm2 = vweird.f32 %v2188_v33  ;;  %821 = vmatpush.msra.mxu2 %v800_v1  ;;  %v798_v3 = vld [vmem:[%s2994_s9 + $0x8] sm:$0xff]  ;;  %s3023_s20 = smov 112  }
  0x2c   : > { %717 = vmatpush.msra.mxu3 %v675_v11  ;;  %v680_v26 = vld [vmem:[%s3046_s2] sm:$0x1f]  ;;  %s3020_s2 = smov 80  }
  0x2d   : > { %690 = vmatpush.msra.mxu0 %v666_v9  ;;  %v733_v35 = vsub.f32 1.0, %v732_v34  ;;  %v2169_v53 = vld [vmem:[%s3047_s22] ss:$0 sm:$0xff]  ;;  %822 = vmatpush.msra.mxu2 %v799_v2  ;;  %s3021_s22 = smov 72  }
  0x2e   : > { %718 = vmatpush.msra.mxu3 %v674_v12  ;;  %v2170_v56 = vld [vmem:[%s3048_s30] ss:$0 sm:$0xff]  ;;  %s3019_s30 = smov 48  }
  0x2f   : > { %691 = vmatpush.msra.mxu0 %v665_v10  ;;  %v734_v36 = vmul.f32 %v2188_v33, %v733_v35  ;;  %v797_v4 = vld [vmem:[%s2994_s9] sm:$0xff]  ;;  %823 = vmatpush.msra.mxu2 %v798_v3 }
  0x30   : > { %719 = vmatpush.msra.mxu3 %v673_v14  ;;  %v2171_v14 = vld [vmem:[%s3049_s28] ss:$0 sm:$0xff] }
  0x31   : > { %692 = vmatpush.msra.mxu0 %v664_v13  ;;  %v735_v37 = vadd.f32 %v2188_v33, %v734_v36  ;;  %824 = vmatpush.msra.mxu2 %v797_v4 }
  0x32   : > { %720 = vmatpush.msra.mxu3 %v672_v16 }
  0x33   : > { %693 = vmatpush.msra.mxu0 %v663_v15  ;;  %2031 = vmatmul.msk.f32.vlgmr.msra.gmra.mxu3 %vm681_vm0, %v655_v17  ;;  %v2556_v38 = vsel %vm736_vm2, %v2188_v33, %v735_v37  ;;  %v2172_v17 = vld [vmem:[%s3050_s6] ss:$0 sm:$0xff] }
  0x35   : > { %694 = vmatpush.msra.mxu0 %v662_v18 }
  0x37   : > { %695 = vmatpush.msra.mxu0 %v661_v19 }
  0x39   : > { %696 = vmatpush.msra.mxu0 %v660_v20  ;;  %v2173_v20 = vld [vmem:[%s2995_s10] ss:$0 sm:$0xff] }
  0x3b   : > { %697 = vmatpush.msra.mxu0 %v659_v21 }
  0x3d   : > { %698 = vmatpush.msra.mxu0 %v658_v22 }
  0x3f   : > { %699 = vmatpush.msra.mxu0 %v657_v23 }
  0x41   : > { %700 = vmatpush.msra.mxu0 %v656_v24 }
  0x42   : > { %701 = vmatmul.f32.vlgmr.msra.gmra.mxu0 %v654_v25 }
  0xb6   : > { %v722_v28 = vpop.f32.mrf.mxu3 }
  0xbf   : > { %v702_v27 = vpop.f32.mrf.mxu0 }
  0xc0   : > { %v703_v29 = vadd.f32 %v702_v27, %v680_v26 }
  0xc2   : > { %v723_v30 = vadd.f32 %v722_v28, %v703_v29 }
  0xc4   : > { %v728_v31 = vsel %vm727_vm1, %v723_v30, 0.0 }
  0xc5   : > { %729 = vadd.xlane.f32.xlu0 %v728_v31 }
 0x138   : > { %v730_v39 = vpop.xlane.xlu0 %729 }
 0x139   : > { %v738_v40 = vmul.f32 %v2556_v38, %v730_v39 }
 0x13b   : > { %v739_v41 = vsub.f32 %v723_v30, %v738_v40 }
 0x13d   : > { %v740_v42 = vmul.f32 %v739_v41, %v739_v41 }
 0x13f   : > { %v741_v43 = vsel %vm727_vm1, %v740_v42, 0.0 }
 0x140   : > { %742 = vadd.xlane.f32.xlu0 %v741_v43 }
 0x1b3   : > { %v743_v44 = vpop.xlane.xlu0 %742 }
 0x1b4   : > { %v744_v45 = vmul.f32 %v743_v44, %v2556_v38 }
 0x1b6   : > { %v745_v46 = vadd.f32 1e-05, %v744_v45 }
 0x1b8   : > { %2189 = vrsqrt.f32 %v745_v46  ;;  %vm752_vm4 = vweird.f32 %v745_v46 }
 0x1be   : > { %v2190_v47 = vpop.eup %2189 }
 0x1bf   : > { %v747_v48 = vmul.f32 %v2190_v47, %v745_v46  ;;  %vm753_vm3 = vweird.f32 %v2190_v47 }
 0x1c0   : > { %vm754_vm5 = vmor %vm752_vm4, %vm753_vm3 }
 0x1c1   : > { %v748_v49 = vmul.f32 %v2190_v47, %v747_v48 }
 0x1c3   : > { %v749_v50 = vmul.f32 0.5, %v748_v49 }
 0x1c5   : > { %v750_v51 = vsub.f32 1.5, %v749_v50 }
 0x1c7   : > { %v751_v52 = vmul.f32 %v2190_v47, %v750_v51 }
 0x1c9   : > { %v755_v54 = vsel %vm754_vm5, %v2190_v47, %v751_v52 }
 0x1ca   : > { %v756_v55 = vmul.f32 %v755_v54, %v739_v41 }
 0x1cc   : > { %v760_v57 = vmul.f32 %v2169_v53, %v756_v55  ;;  %v829_v55 = vld [vmem:[%s2996_s11] sm:$0xff] }
 0x1ce   : > { %v2567_v58 = vadd.f32 %v2170_v56, %v760_v57  ;;  %v830_v57 = vld [vmem:[%s2996_s11 + $0x8] sm:$0xff] }
 0x1cf   : > { %988 = vmatpush.msra.mxu1 %v830_v57 }
 0x1d0   : > { %v767_v59 = vsel %vm727_vm1, %v2567_v58, 0.0 }
 0x1d1   : > { %768 = vadd.xlane.f32.xlu1 %v767_v59 }
 0x244   : > { %v769_v60 = vpop.xlane.xlu1 %768 }
 0x245   : > { %v770_v61 = vmul.f32 %v769_v60, %v2556_v38 }
 0x247   : > { %v771_v62 = vsub.f32 %v2567_v58, %v770_v61 }
 0x249   : > { %v772_v63 = vmul.f32 %v771_v62, %v771_v62 }
 0x24b   : > { %v773_v0 = vsel %vm727_vm1, %v772_v63, 0.0 }
 0x24c   : > { %774 = vadd.xlane.f32.xlu1 %v773_v0 }
 0x2bf   : > { %v775_v5 = vpop.xlane.xlu1 %774 }
 0x2c0   : > { %v776_v6 = vmul.f32 %v775_v5, %v2556_v38 }
 0x2c2   : > { %v777_v7 = vadd.f32 1e-05, %v776_v6 }
 0x2c4   : > { %2191 = vrsqrt.f32 %v777_v7  ;;  %vm784_vm7 = vweird.f32 %v777_v7 }
 0x2ca   : > { %v2192_v8 = vpop.eup %2191 }
 0x2cb   : > { %v779_v9 = vmul.f32 %v2192_v8, %v777_v7  ;;  %vm785_vm6 = vweird.f32 %v2192_v8 }
 0x2cc   : > { %vm786_vm8 = vmor %vm784_vm7, %vm785_vm6 }
 0x2cd   : > { %v780_v10 = vmul.f32 %v2192_v8, %v779_v9 }
 0x2cf   : > { %v781_v11 = vmul.f32 0.5, %v780_v10 }
 0x2d1   : > { %v782_v12 = vsub.f32 1.5, %v781_v11 }
 0x2d3   : > { %v783_v13 = vmul.f32 %v2192_v8, %v782_v12 }
 0x2d5   : > { %v787_v15 = vsel %vm786_vm8, %v2192_v8, %v783_v13 }
 0x2d6   : > { %v788_v16 = vmul.f32 %v787_v15, %v771_v62 }
 0x2d8   : > { %v792_v18 = vmul.f32 %v2171_v14, %v788_v16 }
 0x2da   : > { %v796_v19 = vadd.f32 %v2172_v17, %v792_v18 }
 0x2dc   : > { %2032 = vmatmul.msk.f32.vlgmr.msra.gmra.mxu2 %vm805_vm9, %v796_v19 }
 0x35f   : > { %v826_v21 = vpop.f32.mrf.mxu2 }
 0x360   : > { %v2597_v22 = vadd.f32 %v2173_v20, %v826_v21  ;;  %v831_v20 = vld [vmem:[%s2996_s11 + $0x10] sm:$0xff] }
 0x362   : > { %903 = vrot.lane.b32.xlu0 %v2597_v22, %s2306_s5  ;;  %834 = vrot.lane.b32.xlu2 %v2597_v22, %s3025_s29  ;;  %s3060_s29 = smov 40  }
 0x36a   : > { %874 = vrot.lane.b32.xlu0 %v2597_v22, %s3017_s23  ;;  %905 = vrot.lane.b32.xlu2 %v2597_v22, %s2309_s1  ;;  %s3018_s23 = smov 40  }
 0x372   : > { %1018 = vrot.lane.b32.xlu0 %v2597_v22, %s3020_s2  ;;  %s3058_s2 = smov 64  }
 0x37a   : > { %1016 = vrot.lane.b32.xlu0 %v2597_v22, %s3023_s20 }
 0x382   : > { %1107 = vrot.lane.b32.xlu0 %v2597_v22, %s3022_s27  ;;  %s3059_s27 = smov 48  }
 0x3bc   : > { %v835_v23 = vpop.permute.xlu2 %834 }
 0x3bd   : > { %2033 = vmatpush.xpose.msk.msrb.mxu0 %vm836_vm10, %v835_v23 }
 0x3c0   : > { %2034 = vmatmul.msk.f32.vlgmr.msrb.gmra.mxu0 %vm836_vm10, %v2597_v22 }
 0x3c4   : > { %v906_v24 = vpop.permute.xlu2 %905 }
 0x3c5   : > { %2037 = vmatpush.xpose.msk.msrb.mxu2 %vm836_vm10, %v906_v24 }
 0x3c9   : > { %1011 = vmatpush.msra.mxu2 %v829_v55 }
 0x3d4   : > { %v904_v25 = vpop.permute.xlu0 %903 }
 0x3d5   : > { %2038 = vmatmul.msk.f32.vlgmr.msrb.gmra.mxu2 %vm836_vm10, %v904_v25 }
 0x3d6   : > { %1101 = vmatpush.msrb.mxu2 %v831_v20 }
 0x3dc   : > { %v875_v26 = vpop.permute.xlu0 %874 }
 0x3dd   : > { %2035 = vmatpush.msk.msrb.mxu3 %vm880_vm11, %v875_v26 }
 0x3e4   : > { %v1019_v49 = vpop.permute.xlu0 %1018 }
 0x3ec   : > { %v1017_v53 = vpop.permute.xlu0 %1016 }
 0x3f4   : > { %v1108_v54 = vpop.permute.xlu0 %1107 }
 0x43d   : > { %v858_v27 = vpop.f32.mrf.mxu0 }
 0x43e   : > { %v861_v28 = vmul.f32 0.35355338, %v858_v27 }
 0x440   : > { %v863_v29 = vsel %vm862_vm12, %v861_v28, -inf }
 0x441   : > { %864 = vmax.xlane.f32.xlu1 %v863_v29 }
 0x458   : > { %v928_v30 = vpop.f32.mrf.mxu2 }
 0x459   : > { %v931_v31 = vmul.f32 0.35355338, %v928_v30 }
 0x45b   : > { %v932_v32 = vsel %vm862_vm12, %v931_v31, -inf }
 0x45c   : > { %933 = vmax.xlane.f32.xlu2 %v932_v32 }
 0x474   : > { %1109 = vrot.lane.b32.xlu2 %v2597_v22, %s3021_s22  ;;  %s647_s22 = sand.u32 1, %s2295_s25  }
 0x4b4   : > { %v865_v33 = vpop.xlane.xlu1 %864 }
 0x4b5   : > { %v866_v34 = vsub.f32 %v861_v28, %v865_v33 }
 0x4b7   : > { %v867_v35 = vmul.f32 1.442695, %v866_v34 }
 0x4b9   : > { %2193 = vpow2.f32 %v867_v35 }
 0x4bf   : > { %v2194_v36 = vpop.eup %2193 }
 0x4c0   : > { %v869_v37 = vsel %vm862_vm12, %v2194_v36, 0.0 }
 0x4c1   : > { %870 = vadd.xlane.f32.xlu1 %v869_v37 }
 0x4cf   : > { %v934_v39 = vpop.xlane.xlu2 %933 }
 0x4d0   : > { %v935_v40 = vsub.f32 %v931_v31, %v934_v39  ;;  %v2174_v31 = vld [vmem:[%s2997_s12] ss:$0 sm:$0xff] }
 0x4d2   : > { %v936_v41 = vmul.f32 1.442695, %v935_v40 }
 0x4d4   : > { %2195 = vpow2.f32 %v936_v41  ;;  %v1239_v41 = vld [vmem:[%s2998_s13 + $0x18] sm:$0xff] }
 0x4d7   : > { %v1110_v52 = vpop.permute.xlu2 %1109 }
 0x4da   : > { %v2196_v42 = vpop.eup %2195 }
 0x4db   : > { %v938_v43 = vsel %vm862_vm12, %v2196_v42, 0.0 }
 0x4dc   : > { %939 = vadd.xlane.f32.xlu1 %v938_v43  ;;  %v1236_v43 = vld [vmem:[%s2998_s13] sm:$0xff] }
 0x4f5   : > { %943 = vrot.lane.b32.xlu1 %v2597_v22, %s3024_s0 }
 0x534   : > { %v871_v44 = vpop.xlane.xlu1 %870 }
 0x535   : > { %2197 = vrcp.f32 %v871_v44 }
 0x53b   : > { %v2198_v45 = vpop.eup %2197 }
 0x53c   : > { %v873_v46 = vmul.f32 %v2198_v45, %v2194_v36 }
 0x53e   : > { %2036 = vmatmul.msk.f32.vlgmr.msrb.gmra.mxu3 %vm876_vm13, %v873_v46 }
 0x54f   : > { %v940_v47 = vpop.xlane.xlu1 %939 }
 0x550   : > { %2199 = vrcp.f32 %v940_v47 }
 0x556   : > { %v2200_v48 = vpop.eup %2199 }
 0x557   : > { %v942_v50 = vmul.f32 %v2200_v48, %v2196_v42  ;;  %v1237_v42 = vld [vmem:[%s2998_s13 + $0x8] sm:$0xff] }
 0x567   : > { %v944_v51 = vpop.permute.xlu1 %943 }
 0x568   : > { %2039 = vmatpush.msk.msra.mxu3 %vm880_vm11, %v944_v51 }
 0x569   : > { %2040 = vmatmul.msk.f32.vlgmr.msra.gmra.mxu3 %vm876_vm13, %v942_v50 }
 0x56a   : > { %2043 = vmatpush.xpose.msk.msrb.mxu3 %vm836_vm10, %v1019_v49 }
 0x56e   : > { %2048 = vmatpush.xpose.msk.msra.mxu3 %vm836_vm10, %v1110_v52 }
 0x571   : > { %2044 = vmatmul.msk.f32.vlgmr.msrb.gmra.mxu3 %vm836_vm10, %v1017_v53  ;;  %v2175_v53 = vld [vmem:[%s3051_s7] ss:$0 sm:$0xff] }
 0x579   : > { %2049 = vmatmul.msk.f32.vlgmr.msra.gmra.mxu3 %vm836_vm10, %v1108_v54 }
 0x5c1   : > { %v900_v56 = vpop.f32.mrf.mxu3 }
 0x5c2   : > { %2042 = vmatmul.msk.f32.vlgmr.msra.gmra.mxu2 %vm836_vm10, %v900_v56  ;;  %v2176_v56 = vld [vmem:[%s2993_s8] ss:$0 sm:$0xff] }
 0x5c3   : > { %1259 = vmatpush.msra.mxu2 %v1239_v41 }
 0x5ec   : > { %v967_v59 = vpop.f32.mrf.mxu3 }
 0x5ed   : > { %2041 = vmatmul.msk.f32.vlgmr.msra.gmra.mxu1 %vm836_vm10, %v967_v59 }
 0x5f4   : > { %v1041_v60 = vpop.f32.mrf.mxu3 }
 0x5f5   : > { %v1044_v61 = vmul.f32 0.35355338, %v1041_v60  ;;  %v1303_v60 = vld [vmem:[%s3000_s15 + $0x78] sm:$0xff] }
 0x5f6   : > { %1308 = vmatpush.msrb.mxu3 %v1303_v60  ;;  %v2181_v60 = vld [vmem:[%s2995_s10 + $0x1] ss:$0 sm:$0xff] }
 0x5f7   : > { %v1045_v62 = vsel %vm862_vm12, %v1044_v61, -inf }
 0x5f8   : > { %1046 = vmax.xlane.f32.xlu1 %v1045_v62  ;;  %v1301_v62 = vld [vmem:[%s3000_s15 + $0x68] sm:$0xff] }
 0x5fc   : > { %v1132_v63 = vpop.f32.mrf.mxu3 }
 0x5fd   : > { %v1135_v0 = vmul.f32 0.35355338, %v1132_v63  ;;  %v1300_v63 = vld [vmem:[%s3000_s15 + $0x60] sm:$0xff] }
 0x5ff   : > { %v1136_v1 = vsel %vm862_vm12, %v1135_v0, -inf }
 0x600   : > { %1137 = vmax.xlane.f32.xlu0 %v1136_v1  ;;  %v1298_v1 = vld [vmem:[%s3000_s15 + $0x50] sm:$0xff] }
 0x614   : > { %1056 = vrot.lane.b32.xlu0 %v2597_v22, %s3019_s30  ;;  %s3052_s30 = smov 96  }
 0x645   : > { %v1013_v25 = vpop.f32.mrf.mxu2 }
 0x66a   : > { %v990_v21 = vpop.f32.mrf.mxu1 }
 0x66b   : > { %v1047_v2 = vpop.xlane.xlu1 %1046  ;;  %v1014_v27 = vadd.f32 %v1013_v25, %v990_v21 }
 0x66c   : > { %v1048_v3 = vsub.f32 %v1044_v61, %v1047_v2  ;;  %v1302_v61 = vld [vmem:[%s3000_s15 + $0x70] sm:$0xff]  ;;  %v1297_v2 = vld [vmem:[%s3000_s15 + $0x48] sm:$0xff] }
 0x66d   : > { %1309 = vmatpush.msrb.mxu3 %v1302_v61 }
 0x66e   : > { %v1049_v4 = vmul.f32 1.442695, %v1048_v3  ;;  %v1296_v3 = vld [vmem:[%s3000_s15 + $0x40] sm:$0xff] }
 0x66f   : > { %1310 = vmatpush.msrb.mxu3 %v1301_v62 }
 0x670   : > { %2201 = vpow2.f32 %v1049_v4  ;;  %v1295_v4 = vld [vmem:[%s3000_s15 + $0x38] sm:$0xff] }
 0x671   : > { %1311 = vmatpush.msrb.mxu3 %v1300_v63 }
 0x673   : > { %v1138_v5 = vpop.xlane.xlu0 %1137 }
 0x674   : > { %v1139_v6 = vsub.f32 %v1135_v0, %v1138_v5  ;;  %v1299_v0 = vld [vmem:[%s3000_s15 + $0x58] sm:$0xff]  ;;  %v1294_v5 = vld [vmem:[%s3000_s15 + $0x30] sm:$0xff] }
 0x675   : > { %1312 = vmatpush.msrb.mxu3 %v1299_v0 }
 0x676   : > { %v2202_v7 = vpop.eup %2201  ;;  %v1140_v8 = vmul.f32 1.442695, %v1139_v6  ;;  %v1293_v6 = vld [vmem:[%s3000_s15 + $0x28] sm:$0xff] }
 0x677   : > { %v1051_v9 = vsel %vm862_vm12, %v2202_v7, 0.0  ;;  %1313 = vmatpush.msrb.mxu3 %v1298_v1 }
 0x678   : > { %2203 = vpow2.f32 %v1140_v8  ;;  %1052 = vadd.xlane.f32.xlu2 %v1051_v9  ;;  %v1291_v8 = vld [vmem:[%s3000_s15 + $0x18] sm:$0xff]  ;;  %v2177_v9 = vld [vmem:[%s2999_s14] ss:$0 sm:$0xff] }
 0x679   : > { %1314 = vmatpush.msrb.mxu3 %v1297_v2 }
 0x67b   : > { %1315 = vmatpush.msrb.mxu3 %v1296_v3 }
 0x67d   : > { %1316 = vmatpush.msrb.mxu3 %v1295_v4 }
 0x67e   : > { %v2204_v10 = vpop.eup %2203 }
 0x67f   : > { %v1142_v11 = vsel %vm862_vm12, %v2204_v10, 0.0  ;;  %1317 = vmatpush.msrb.mxu3 %v1294_v5 }
 0x680   : > { %1143 = vadd.xlane.f32.xlu1 %v1142_v11 }
 0x681   : > { %1318 = vmatpush.msrb.mxu3 %v1293_v6 }
 0x686   : > { %v1057_v12 = vpop.permute.xlu0 %1056 }
 0x687   : > { %2045 = vmatpush.msk.msrb.mxu1 %vm880_vm11, %v1057_v12  ;;  %v1289_v12 = vld [vmem:[%s3000_s15 + $0x8] sm:$0xff] }
 0x699   : > { %1147 = vrot.lane.b32.xlu1 %v2597_v22, %s3018_s23  ;;  %v832_v22 = vld [vmem:[%s2996_s11 + $0x18] sm:$0xff]  ;;  %s3053_s23 = smov 56  }
 0x69a   : > { %1192 = vmatpush.msra.mxu1 %v832_v22 }
 0x6eb   : > { %v1053_v13 = vpop.xlane.xlu2 %1052 }
 0x6ec   : > { %2205 = vrcp.f32 %v1053_v13 }
 0x6f2   : > { %v2206_v14 = vpop.eup %2205 }
 0x6f3   : > { %v1055_v15 = vmul.f32 %v2206_v14, %v2202_v7  ;;  %v1144_v16 = vpop.xlane.xlu1 %1143  ;;  %v1292_v7 = vld [vmem:[%s3000_s15 + $0x20] sm:$0xff] }
 0x6f4   : > { %2207 = vrcp.f32 %v1144_v16  ;;  %1319 = vmatpush.msrb.mxu3 %v1292_v7  ;;  %v1288_v14 = vld [vmem:[%s3000_s15] sm:$0xff] }
 0x6f5   : > { %2046 = vmatmul.msk.f32.vlgmr.msrb.gmra.mxu1 %vm876_vm13, %v1055_v15 }
 0x6f6   : > { %1320 = vmatpush.msrb.mxu3 %v1291_v8 }
 0x6fa   : > { %v2208_v17 = vpop.eup %2207 }
 0x6fb   : > { %v1146_v18 = vmul.f32 %v2208_v17, %v2204_v10  ;;  %v1290_v10 = vld [vmem:[%s3000_s15 + $0x10] sm:$0xff] }
 0x6fc   : > { %1321 = vmatpush.msrb.mxu3 %v1290_v10 }
 0x6fe   : > { %1322 = vmatpush.msrb.mxu3 %v1289_v12 }
 0x700   : > { %1323 = vmatpush.msrb.mxu3 %v1288_v14 }
 0x70b   : > { %v1148_v19 = vpop.permute.xlu1 %1147 }
 0x70c   : > { %2050 = vmatpush.msk.msra.mxu0 %vm880_vm11, %v1148_v19 }
 0x70d   : > { %2051 = vmatmul.msk.f32.vlgmr.msra.gmra.mxu0 %vm876_vm13, %v1146_v18 }
 0x772   : > { %v1080_v23 = vpop.f32.mrf.mxu1 }
 0x773   : > { %2047 = vmatmul.msk.f32.vlgmr.msrb.gmra.mxu2 %vm836_vm10, %v1080_v23 }
 0x78a   : > { %v1171_v24 = vpop.f32.mrf.mxu0 }
 0x78b   : > { %2052 = vmatmul.msk.f32.vlgmr.msra.gmra.mxu1 %vm836_vm10, %v1171_v24 }
 0x7f6   : > { %v1103_v26 = vpop.f32.mrf.mxu2 }
 0x7f7   : > { %v1106_v28 = vadd.f32 %v1103_v26, %v1014_v27 }
 0x808   : > { %v1194_v29 = vpop.f32.mrf.mxu1 }
 0x809   : > { %v1197_v30 = vadd.f32 %v1194_v29, %v1106_v28 }
 0x80b   : > { %v1198_v32 = vadd.f32 %v1197_v30, %v2567_v58  ;;  %v1238_v58 = vld [vmem:[%s2998_s13 + $0x10] sm:$0xff]  ;;  %v2178_v30 = vld [vmem:[%s3001_s16] ss:$0 sm:$0xff] }
 0x80c   : > { %1260 = vmatpush.msra.mxu2 %v1238_v58  ;;  %v2060_v58 = vld [vmem:[%s2994_s9 + $0x38] sm:$0xff] }
 0x80d   : > { %v2666_v33 = vadd.f32 %v2174_v31, %v1198_v32  ;;  %1388 = vmatpush.msrb.mxu0 %v2060_v58 }
 0x80e   : > { %1261 = vmatpush.msra.mxu2 %v1237_v42  ;;  %v2058_v42 = vld [vmem:[%s2994_s9 + $0x28] sm:$0xff] }
 0x80f   : > { %v1206_v34 = vsel %vm727_vm1, %v2666_v33, 0.0 }
 0x810   : > { %1207 = vadd.xlane.f32.xlu2 %v1206_v34  ;;  %1262 = vmatpush.msra.mxu2 %v1236_v43  ;;  %v2057_v43 = vld [vmem:[%s2994_s9 + $0x20] sm:$0xff] }
 0x883   : > { %v1208_v35 = vpop.xlane.xlu2 %1207 }
 0x884   : > { %v1209_v36 = vmul.f32 %v1208_v35, %v2556_v38 }
 0x886   : > { %v1210_v37 = vsub.f32 %v2666_v33, %v1209_v36 }
 0x888   : > { %v1211_v39 = vmul.f32 %v1210_v37, %v1210_v37 }
 0x88a   : > { %v1212_v40 = vsel %vm727_vm1, %v1211_v39, 0.0 }
 0x88b   : > { %1213 = vadd.xlane.f32.xlu0 %v1212_v40 }
 0x8fe   : > { %v1214_v44 = vpop.xlane.xlu0 %1213 }
 0x8ff   : > { %v1215_v45 = vmul.f32 %v1214_v44, %v2556_v38 }
 0x901   : > { %v1216_v46 = vadd.f32 1e-05, %v1215_v45 }
 0x903   : > { %2209 = vrsqrt.f32 %v1216_v46  ;;  %vm1223_vm15 = vweird.f32 %v1216_v46 }
 0x909   : > { %v2210_v47 = vpop.eup %2209 }
 0x90a   : > { %v1218_v48 = vmul.f32 %v2210_v47, %v1216_v46  ;;  %vm1224_vm14 = vweird.f32 %v2210_v47 }
 0x90b   : > { %vm1225_vm0 = vmor %vm1223_vm15, %vm1224_vm14 }
 0x90c   : > { %v1219_v49 = vmul.f32 %v2210_v47, %v1218_v48 }
 0x90e   : > { %v1220_v50 = vmul.f32 0.5, %v1219_v49 }
 0x910   : > { %v1221_v51 = vsub.f32 1.5, %v1220_v50 }
 0x912   : > { %v1222_v52 = vmul.f32 %v2210_v47, %v1221_v51 }
 0x914   : > { %v1226_v54 = vsel %vm1225_vm0, %v2210_v47, %v1222_v52  ;;  %vm1902_vm0 = vcmask 253952  }
 0x915   : > { %v1227_v55 = vmul.f32 %v1226_v54, %v1210_v37 }
 0x917   : > { %v1231_v57 = vmul.f32 %v2175_v53, %v1227_v55  ;;  %v2179_v53 = vld [vmem:[%s3049_s28 + $0x1] ss:$0 sm:$0xff] }
 0x919   : > { %v1235_v59 = vadd.f32 %v2176_v56, %v1231_v57  ;;  %v2180_v56 = vld [vmem:[%s3050_s6 + $0x1] ss:$0 sm:$0xff] }
 0x91b   : > { %2053 = vmatmul.msk.f32.vlgmr.msra.gmra.mxu2 %vm805_vm9, %v1235_v59 }
 0x99e   : > { %v1264_v11 = vpop.f32.mrf.mxu2 }
 0x99f   : > { %v1265_v13 = vadd.f32 %v2177_v9, %v1264_v11 }
 0x9a1   : > { %v2054_v15 = vmul.f32 -1.702, %v1265_v13 }
 0x9a3   : > { %v1269_v16 = vmul.f32 1.442695, %v2054_v15 }
 0x9a5   : > { %2211 = vpow2.f32 %v1269_v16 }
 0x9ab   : > { %v2212_v17 = vpop.eup %2211 }
 0x9ac   : > { %v1271_v18 = vadd.f32 1.0, %v2212_v17 }
 0x9ae   : > { %2213 = vrcp.f32 %v1271_v18  ;;  %v1283_v22 = vand.u32 2147483648, %v1271_v18  ;;  %v1281_v24 = vand.u32 2147483647, %v1271_v18  ;;  %vm1277_vm3 = vweird.f32 %v1271_v18 }
 0x9b0   : > { %v1284_v26 = vor.u32 1.1754944e-38, %v1283_v22  ;;  %vm1282_vm5 = vcmp.eq.f32.partialorder %v1281_v24, 8.507059e+37 }
 0x9b4   : > { %v2214_v19 = vpop.eup %2213 }
 0x9b5   : > { %v1273_v20 = vmul.f32 %v2214_v19, %v1271_v18  ;;  %vm1278_vm2 = vweird.f32 %v2214_v19 }
 0x9b6   : > { %vm1279_vm4 = vmor %vm1277_vm3, %vm1278_vm2 }
 0x9b7   : > { %v1274_v21 = vsub.f32 1.0, %v1273_v20 }
 0x9b9   : > { %v1275_v23 = vmul.f32 %v2214_v19, %v1274_v21 }
 0x9bb   : > { %v1276_v25 = vadd.f32 %v2214_v19, %v1275_v23 }
 0x9bd   : > { %v1280_v27 = vsel %vm1279_vm4, %v2214_v19, %v1276_v25 }
 0x9be   : > { %v1285_v28 = vsel %vm1282_vm5, %v1284_v26, %v1280_v27  ;;  %vm1955_vm5 = vcmask 73728  }
 0x9bf   : > { %v1287_v29 = vmul.f32 %v1285_v28, %v1265_v13 }
 0x9c1   : > { %1324 = vmatmul.f32.vlgmr.msrb.gmra.mxu3 %v1287_v29 }
 0xa44   : > { %v1325_v31 = vpop.f32.mrf.mxu3 }
 0xa45   : > { %v1326_v32 = vadd.f32 %v2178_v30, %v1325_v31 }
 0xa47   : > { %v2748_v34 = vadd.f32 %v1326_v32, %v2666_v33  ;;  %v2059_v33 = vld [vmem:[%s2994_s9 + $0x30] sm:$0xff] }
 0xa48   : > { %1389 = vmatpush.msrb.mxu0 %v2059_v33 }
 0xa49   : > { %v1333_v35 = vsel %vm727_vm1, %v2748_v34, 0.0 }
 0xa4a   : > { %1334 = vadd.xlane.f32.xlu2 %v1333_v35  ;;  %1390 = vmatpush.msrb.mxu0 %v2058_v42  ;;  %v2064_v42 = vld [vmem:[%s2996_s11 + $0x28] sm:$0xff] }
 0xa4c   : > { %1391 = vmatpush.msrb.mxu0 %v2057_v43 }
 0xabd   : > { %v1335_v36 = vpop.xlane.xlu2 %1334 }
 0xabe   : > { %v1336_v37 = vmul.f32 %v1335_v36, %v2556_v38 }
 0xac0   : > { %v1337_v39 = vsub.f32 %v2748_v34, %v1336_v37 }
 0xac2   : > { %v1338_v40 = vmul.f32 %v1337_v39, %v1337_v39 }
 0xac4   : > { %v1339_v41 = vsel %vm727_vm1, %v1338_v40, 0.0 }
 0xac5   : > { %1340 = vadd.xlane.f32.xlu2 %v1339_v41 }
 0xb38   : > { %v1341_v44 = vpop.xlane.xlu2 %1340 }
 0xb39   : > { %v1342_v45 = vmul.f32 %v1341_v44, %v2556_v38 }
 0xb3b   : > { %v1343_v46 = vadd.f32 1e-05, %v1342_v45 }
 0xb3d   : > { %2215 = vrsqrt.f32 %v1343_v46  ;;  %vm1350_vm7 = vweird.f32 %v1343_v46 }
 0xb43   : > { %v2216_v47 = vpop.eup %2215 }
 0xb44   : > { %v1345_v48 = vmul.f32 %v2216_v47, %v1343_v46  ;;  %vm1351_vm6 = vweird.f32 %v2216_v47 }
 0xb45   : > { %vm1352_vm8 = vmor %vm1350_vm7, %vm1351_vm6 }
 0xb46   : > { %v1346_v49 = vmul.f32 %v2216_v47, %v1345_v48 }
 0xb48   : > { %v1347_v50 = vmul.f32 0.5, %v1346_v49  ;;  %v2063_v49 = vld [vmem:[%s2996_s11 + $0x20] sm:$0xff] }
 0xb4a   : > { %v1348_v51 = vsub.f32 1.5, %v1347_v50 }
 0xb4c   : > { %v1349_v52 = vmul.f32 %v2216_v47, %v1348_v51 }
 0xb4e   : > { %v1353_v54 = vsel %vm1352_vm8, %v2216_v47, %v1349_v52 }
 0xb4f   : > { %v1354_v55 = vmul.f32 %v1353_v54, %v1337_v39 }
 0xb51   : > { %v1358_v57 = vmul.f32 %v2179_v53, %v1354_v55 }
 0xb53   : > { %v1362_v59 = vadd.f32 %v2180_v56, %v1358_v57 }
 0xb55   : > { %2062 = vmatmul.msk.f32.vlgmr.msrb.gmra.mxu0 %vm805_vm9, %v1362_v59 }
 0xbd2   : > { %v1393_v61 = vpop.f32.mrf.mxu0 }
 0xbd3   : > { %v2778_v62 = vadd.f32 %v2181_v60, %v1393_v61  ;;  %v2065_v60 = vld [vmem:[%s2996_s11 + $0x30] sm:$0xff]  ;;  %v2066_v61 = vld [vmem:[%s2996_s11 + $0x38] sm:$0xff] }
 0xbd4   : > { %1756 = vmatpush.msra.mxu3 %v2066_v61 }
 0xbd5   : > { %1467 = vrot.lane.b32.xlu2 %v2778_v62, %s2306_s5  ;;  %1469 = vrot.lane.b32.xlu1 %v2778_v62, %s2309_s1  ;;  %s3056_s5 = smov 72   ;;  %s3057_s1 = smov 80  }
 0xbdd   : > { %1402 = vrot.lane.b32.xlu2 %v2778_v62, %s3052_s30 }
 0xbe5   : > { %1507 = vrot.lane.b32.xlu2 %v2778_v62, %s3053_s23  ;;  %s3061_s23 = sld [smem:[#allocation20_spill]] }
 0xbed   : > { %1580 = vrot.lane.b32.xlu2 %v2778_v62, %s3054_s4 }
 0xbf5   : > { %1671 = vrot.lane.b32.xlu2 %v2778_v62, %s3055_s26  ;;  %s648_s26 = scalar_lea.vmem [#allocation2], %s647_s22 }
 0xc2f   : > { %v1468_v63 = vpop.permute.xlu2 %1467 }
 0xc37   : > { %v1403_v0 = vpop.permute.xlu2 %1402 }
 0xc38   : > { %2067 = vmatpush.xpose.msk.msrb.mxu1 %vm836_vm10, %v1403_v0 }
 0xc3b   : > { %2068 = vmatmul.msk.f32.vlgmr.msrb.gmra.mxu1 %vm836_vm10, %v2778_v62 }
 0xc3f   : > { %v1508_v1 = vpop.permute.xlu2 %1507 }
 0xc40   : > { %2073 = vmatpush.msk.msra.mxu1 %vm880_vm11, %v1508_v1 }
 0xc47   : > { %v1470_v2 = vpop.permute.xlu1 %1469  ;;  %v1581_v18 = vpop.permute.xlu2 %1580 }
 0xc48   : > { %2071 = vmatpush.xpose.msk.msra.mxu0 %vm836_vm10, %v1470_v2 }
 0xc4b   : > { %2072 = vmatmul.msk.f32.vlgmr.msra.gmra.mxu0 %vm836_vm10, %v1468_v63 }
 0xc4c   : > { %1575 = vmatpush.msrb.mxu0 %v2063_v49  ;;  %v2099_v49 = vld [vmem:[%s3000_s15 + $0x90] sm:$0xff] }
 0xc4e   : > { %1665 = vmatpush.msra.mxu0 %v2065_v60 }
 0xc4f   : > { %v1672_v20 = vpop.permute.xlu2 %1671 }
 0xcb8   : > { %v1425_v11 = vpop.f32.mrf.mxu1 }
 0xcb9   : > { %v1428_v12 = vmul.f32 0.35355338, %v1425_v11 }
 0xcbb   : > { %v1429_v13 = vsel %vm862_vm12, %v1428_v12, -inf }
 0xcc8   : > { %v1492_v3 = vpop.f32.mrf.mxu0 }
 0xcc9   : > { %v1495_v4 = vmul.f32 0.35355338, %v1492_v3 }
 0xccb   : > { %v1496_v5 = vsel %vm862_vm12, %v1495_v4, -inf }
 0xccc   : > { %1497 = vmax.xlane.f32.xlu1 %v1496_v5 }
 0xce5   : > { %1673 = vrot.lane.b32.xlu1 %v2778_v62, %s3056_s5  ;;  %s1968_s5 = sshll.u32 %s648_s26, 4  ;;  %s1969_s5 = int_to_ptr.vmem [resolvable:$true] %s1968_s5 }
 0xd3f   : > { %v1498_v6 = vpop.xlane.xlu1 %1497 }
 0xd40   : > { %v1499_v7 = vsub.f32 %v1495_v4, %v1498_v6 }
 0xd42   : > { %v1500_v8 = vmul.f32 1.442695, %v1499_v7  ;;  %v2182_v7 = vld [vmem:[%s2997_s12 + $0x1] ss:$0 sm:$0xff] }
 0xd44   : > { %2217 = vpow2.f32 %v1500_v8 }
 0xd4a   : > { %v2218_v9 = vpop.eup %2217 }
 0xd4b   : > { %v1502_v10 = vsel %vm862_vm12, %v2218_v9, 0.0 }
 0xd4c   : > { %1503 = vadd.xlane.f32.xlu0 %v1502_v10 }
 0xd57   : > { %v1674_v19 = vpop.permute.xlu1 %1673 }
 0xd60   : > { %1582 = vrot.lane.b32.xlu0 %v2778_v62, %s3057_s1  ;;  %s1958_s1 = scalar_lea.sflag [#allocation3], %s647_s22 }
 0xd8a   : > { %1430 = vmax.xlane.f32.xlu0 %v1429_v13 }
 0xdbf   : > { %v1504_v14 = vpop.xlane.xlu0 %1503 }
 0xdc0   : > { %2219 = vrcp.f32 %v1504_v14 }
 0xdc6   : > { %v2220_v15 = vpop.eup %2219 }
 0xdc7   : > { %v1506_v16 = vmul.f32 %v2220_v15, %v2218_v9 }
 0xdc9   : > { %2074 = vmatmul.msk.f32.vlgmr.msra.gmra.mxu1 %vm876_vm13, %v1506_v16  ;;  %v2093_v16 = vld [vmem:[%s2998_s13 + $0x38] sm:$0xff] }
 0xdd2   : > { %v1583_v17 = vpop.permute.xlu0 %1582 }
 0xdd3   : > { %2077 = vmatpush.xpose.msk.msrb.mxu1 %vm836_vm10, %v1583_v17  ;;  %v2091_v17 = vld [vmem:[%s2998_s13 + $0x28] sm:$0xff] }
 0xdd6   : > { %2078 = vmatmul.msk.f32.vlgmr.msrb.gmra.mxu1 %vm836_vm10, %v1581_v18  ;;  %v2090_v18 = vld [vmem:[%s2998_s13 + $0x20] sm:$0xff] }
 0xdd7   : > { %2082 = vmatpush.xpose.msk.msra.mxu1 %vm836_vm10, %v1674_v19 }
 0xdde   : > { %2083 = vmatmul.msk.f32.vlgmr.msra.gmra.mxu1 %vm836_vm10, %v1672_v20 }
 0xdfd   : > { %v1431_v21 = vpop.xlane.xlu0 %1430 }
 0xdfe   : > { %v1432_v22 = vsub.f32 %v1428_v12, %v1431_v21 }
 0xe00   : > { %v1433_v23 = vmul.f32 1.442695, %v1432_v22 }
 0xe02   : > { %2221 = vpow2.f32 %v1433_v23 }
 0xe08   : > { %v2222_v24 = vpop.eup %2221 }
 0xe09   : > { %v1435_v25 = vsel %vm862_vm12, %v2222_v24, 0.0 }
 0xe0a   : > { %1436 = vadd.xlane.f32.xlu0 %v1435_v25 }
 0xe46   : > { %v1531_v26 = vpop.f32.mrf.mxu1 }
 0xe53   : > { %v1605_v27 = vpop.f32.mrf.mxu1 }
 0xe54   : > { %v1608_v28 = vmul.f32 0.35355338, %v1605_v27 }
 0xe56   : > { %v1609_v29 = vsel %vm862_vm12, %v1608_v28, -inf }
 0xe57   : > { %1610 = vmax.xlane.f32.xlu2 %v1609_v29 }
 0xe5b   : > { %v1696_v30 = vpop.f32.mrf.mxu1 }
 0xe5c   : > { %v1699_v31 = vmul.f32 0.35355338, %v1696_v30 }
 0xe5e   : > { %v1700_v32 = vsel %vm862_vm12, %v1699_v31, -inf }
 0xe5f   : > { %1701 = vmax.xlane.f32.xlu1 %v1700_v32 }
 0xe6f   : > { %1440 = vrot.lane.b32.xlu2 %v2778_v62, %s3058_s2 }
 0xe7d   : > { %v1437_v35 = vpop.xlane.xlu0 %1436 }
 0xe7e   : > { %2223 = vrcp.f32 %v1437_v35 }
 0xe84   : > { %v2224_v40 = vpop.eup %2223 }
 0xe85   : > { %v1439_v41 = vmul.f32 %v2224_v40, %v2222_v24  ;;  %v2109_v40 = vld [vmem:[%s3000_s15 + $0xe0] sm:$0xff] }
 0xeca   : > { %v1611_v36 = vpop.xlane.xlu2 %1610 }
 0xecb   : > { %v1612_v37 = vsub.f32 %v1608_v28, %v1611_v36  ;;  %v2183_v28 = vld [vmem:[%s3051_s7 + $0x1] ss:$0 sm:$0xff]  ;;  %v2112_v36 = vld [vmem:[%s3000_s15 + $0xf8] sm:$0xff] }
 0xecc   : > { %1879 = vmatpush.msrb.mxu1 %v2112_v36 }
 0xecd   : > { %v1613_v39 = vmul.f32 1.442695, %v1612_v37  ;;  %v2111_v37 = vld [vmem:[%s3000_s15 + $0xf0] sm:$0xff] }
 0xece   : > { %1880 = vmatpush.msrb.mxu1 %v2111_v37 }
 0xecf   : > { %2225 = vpow2.f32 %v1613_v39  ;;  %v2110_v39 = vld [vmem:[%s3000_s15 + $0xe8] sm:$0xff] }
 0xed0   : > { %1881 = vmatpush.msrb.mxu1 %v2110_v39 }
 0xed2   : > { %v1441_v58 = vpop.permute.xlu2 %1440  ;;  %v1702_v33 = vpop.xlane.xlu1 %1701  ;;  %1882 = vmatpush.msrb.mxu1 %v2109_v40 }
 0xed3   : > { %v1703_v43 = vsub.f32 %v1699_v31, %v1702_v33  ;;  %2069 = vmatpush.msk.msrb.mxu2 %vm880_vm11, %v1441_v58  ;;  %v2184_v31 = vld [vmem:[%s2993_s8 + $0x1] ss:$0 sm:$0xff]  ;;  %v2107_v58 = vld [vmem:[%s3000_s15 + $0xd0] sm:$0xff]  ;;  %v2106_v33 = vld [vmem:[%s3000_s15 + $0xc8] sm:$0xff] }
 0xed4   : > { %2070 = vmatmul.msk.f32.vlgmr.msrb.gmra.mxu2 %vm876_vm13, %v1439_v41  ;;  %v2108_v41 = vld [vmem:[%s3000_s15 + $0xd8] sm:$0xff] }
 0xed5   : > { %v2226_v44 = vpop.eup %2225  ;;  %v1704_v45 = vmul.f32 1.442695, %v1703_v43  ;;  %1552 = vmatpush.msra.mxu2 %v2064_v42  ;;  %1883 = vmatpush.msrb.mxu1 %v2108_v41  ;;  %v2105_v42 = vld [vmem:[%s3000_s15 + $0xc0] sm:$0xff]  ;;  %v2104_v43 = vld [vmem:[%s3000_s15 + $0xb8] sm:$0xff] }
 0xed6   : > { %v1615_v46 = vsel %vm862_vm12, %v2226_v44, 0.0 }
 0xed7   : > { %2227 = vpow2.f32 %v1704_v45  ;;  %1616 = vadd.xlane.f32.xlu0 %v1615_v46  ;;  %1884 = vmatpush.msrb.mxu1 %v2107_v58  ;;  %v2102_v45 = vld [vmem:[%s3000_s15 + $0xa8] sm:$0xff]  ;;  %v2101_v46 = vld [vmem:[%s3000_s15 + $0xa0] sm:$0xff] }
 0xed9   : > { %1885 = vmatpush.msrb.mxu1 %v2106_v33 }
 0xedb   : > { %1886 = vmatpush.msrb.mxu1 %v2105_v42 }
 0xedc   : > { %2075 = vmatmul.msk.f32.vlgmr.msra.gmra.mxu2 %vm836_vm10, %v1531_v26 }
 0xedd   : > { %v2228_v47 = vpop.eup %2227  ;;  %1887 = vmatpush.msrb.mxu1 %v2104_v43 }
 0xede   : > { %v1706_v48 = vsel %vm862_vm12, %v2228_v47, 0.0 }
 0xedf   : > { %1707 = vadd.xlane.f32.xlu1 %v1706_v48  ;;  %v2185_v48 = vld [vmem:[%s2999_s14 + $0x1] ss:$0 sm:$0xff] }
 0xeeb   : > { %1620 = vrot.lane.b32.xlu0 %v2778_v62, %s3059_s27  ;;  %s2261_s27 = scalar_lea.hbm %s3006_s21, 2 }
 0xef8   : > { %1711 = vrot.lane.b32.xlu1 %v2778_v62, %s3060_s29  ;;  %s1966_s29 = scalar_lea.hbm %s3006_s21, %s2448_s3 }
 0xef9   : > { %s1970_s6 = sshll.u32 %s1966_s29, 4  ;;  %s1971_s6 = int_to_ptr.hbm [resolvable:$true] %s1970_s6 }
 0xefa   : > { %s2255_s2 = sshra.s32 %s1971_s6, 4  ;;  %s2256_s2 = int_to_ptr.hbm [resolvable:$true] %s2255_s2 }
 0xefb   : > { %s2257_s7 = scalar_lea.hbm %s2256_s2, 1  ;;  %p2262_p0 = scmp.lt.s32.totalorder %s2256_s2, %s3006_s21 }
 0xefc   : > { %p2258_p11 = scmp.ne.s32.totalorder %s2256_s2, %s2257_s7  ;;  %p2263_p1 = scmp.lt.s32.totalorder %s2261_s27, %s2257_s7 }
 0xefe   : > { %p2259_p12 = pnand %p2258_p11, %p2465_p5  ;;  %p2264_p2 = por %p2263_p1, %p2262_p0 }
 0xf00   : > { %p2260_p13 = pneg %p2259_p12 }
 0xf02   : > { %p2265_p3 = pnand %p2264_p2, %p2260_p13 }
 0xf4a   : > { %v1617_v50 = vpop.xlane.xlu0 %1616 }
 0xf4b   : > { %2229 = vrcp.f32 %v1617_v50 }
 0xf51   : > { %v2230_v52 = vpop.eup %2229 }
 0xf52   : > { %v1619_v53 = vmul.f32 %v2230_v52, %v2226_v44  ;;  %v1708_v55 = vpop.xlane.xlu1 %1707  ;;  %v2103_v44 = vld [vmem:[%s3000_s15 + $0xb0] sm:$0xff] }
 0xf53   : > { %2231 = vrcp.f32 %v1708_v55  ;;  %1888 = vmatpush.msrb.mxu1 %v2103_v44 }
 0xf55   : > { %1889 = vmatpush.msrb.mxu1 %v2102_v45 }
 0xf57   : > { %v1464_v51 = vpop.f32.mrf.mxu2  ;;  %1890 = vmatpush.msrb.mxu1 %v2101_v46 }
 0xf58   : > { %2076 = vmatmul.msk.f32.vlgmr.msrb.gmra.mxu0 %vm836_vm10, %v1464_v51  ;;  %v2098_v51 = vld [vmem:[%s3000_s15 + $0x88] sm:$0xff] }
 0xf59   : > { %v2232_v56 = vpop.eup %2231  ;;  %1828 = vmatpush.msrb.mxu0 %v2093_v16 }
 0xf5a   : > { %v1710_v57 = vmul.f32 %v2232_v56, %v2228_v47  ;;  %v2100_v47 = vld [vmem:[%s3000_s15 + $0x98] sm:$0xff] }
 0xf5b   : > { %1891 = vmatpush.msrb.mxu1 %v2100_v47 }
 0xf5d   : > { %v1621_v54 = vpop.permute.xlu0 %1620  ;;  %1892 = vmatpush.msrb.mxu1 %v2099_v49 }
 0xf5e   : > { %2079 = vmatpush.msk.msrb.mxu2 %vm880_vm11, %v1621_v54 }
 0xf5f   : > { %2080 = vmatmul.msk.f32.vlgmr.msrb.gmra.mxu2 %vm876_vm13, %v1619_v53  ;;  %v1554_v62 = vpop.f32.mrf.mxu2  ;;  %1893 = vmatpush.msrb.mxu1 %v2098_v51  ;;  %v2097_v53 = vld [vmem:[%s3000_s15 + $0x80] sm:$0xff] }
 0xf61   : > { %1894 = vmatpush.msrb.mxu1 %v2097_v53 }
 0xf6a   : > { %v1712_v59 = vpop.permute.xlu1 %1711 }
 0xf6b   : > { %2084 = vmatpush.msk.msra.mxu2 %vm880_vm11, %v1712_v59 }
 0xf6c   : > { %2085 = vmatmul.msk.f32.vlgmr.msra.gmra.mxu2 %vm876_vm13, %v1710_v57 }
 0xfd5   : > { %v1577_v1 = vpop.f32.mrf.mxu0 }
 0xfd6   : > { %v1578_v3 = vadd.f32 %v1577_v1, %v1554_v62 }
 0xfe2   : > { %v1644_v63 = vpop.f32.mrf.mxu2 }
 0xfe3   : > { %2081 = vmatmul.msk.f32.vlgmr.msra.gmra.mxu0 %vm836_vm10, %v1644_v63 }
 0xfef   : > { %v1735_v0 = vpop.f32.mrf.mxu2 }
 0xff0   : > { %2086 = vmatmul.msk.f32.vlgmr.msra.gmra.mxu3 %vm836_vm10, %v1735_v0 }
0x1060   : > { %v1667_v2 = vpop.f32.mrf.mxu0 }
0x1061   : > { %v1670_v4 = vadd.f32 %v1667_v2, %v1578_v3 }
0x1073   : > { %v1758_v5 = vpop.f32.mrf.mxu3 }
0x1074   : > { %v1761_v6 = vadd.f32 %v1758_v5, %v1670_v4 }
0x1076   : > { %v1762_v8 = vadd.f32 %v1761_v6, %v2748_v34  ;;  %v2092_v34 = vld [vmem:[%s2998_s13 + $0x30] sm:$0xff]  ;;  %v2186_v6 = vld [vmem:[%s3001_s16 + $0x1] ss:$0 sm:$0xff] }
0x1077   : > { %1829 = vmatpush.msrb.mxu0 %v2092_v34  ;;  %v1930_v34 = vld [vmem:[%s3004_s19 + $0x18] sm:$0xff] }
0x1078   : > { %v2847_v9 = vadd.f32 %v2182_v7, %v1762_v8  ;;  %1947 = vmatpush.msrb.mxu2 %v1930_v34 }
0x1079   : > { %1830 = vmatpush.msrb.mxu0 %v2091_v17  ;;  %v1929_v17 = vld [vmem:[%s3004_s19 + $0x10] sm:$0xff] }
0x107a   : > { %v1773_v10 = vsel %vm727_vm1, %v2847_v9, 0.0  ;;  %1948 = vmatpush.msrb.mxu2 %v1929_v17 }
0x107b   : > { %1774 = vadd.xlane.f32.xlu2 %v1773_v10  ;;  %1831 = vmatpush.msrb.mxu0 %v2090_v18  ;;  %v1927_v18 = vld [vmem:[%s3004_s19] sm:$0xff] }
0x10ee   : > { %v1775_v11 = vpop.xlane.xlu2 %1774 }
0x10ef   : > { %v1776_v12 = vmul.f32 %v1775_v11, %v2556_v38 }
0x10f1   : > { %v1777_v13 = vsub.f32 %v2847_v9, %v1776_v12 }
0x10f3   : > { %v1778_v14 = vmul.f32 %v1777_v13, %v1777_v13 }
0x10f5   : > { %v1779_v15 = vsel %vm727_vm1, %v1778_v14, 0.0 }
0x10f6   : > { %1780 = vadd.xlane.f32.xlu0 %v1779_v15 }
0x1169   : > { %v1781_v19 = vpop.xlane.xlu0 %1780 }
0x116a   : > { %v1782_v20 = vmul.f32 %v1781_v19, %v2556_v38 }
0x116c   : > { %v1783_v21 = vadd.f32 1e-05, %v1782_v20 }
0x116e   : > { %2233 = vrsqrt.f32 %v1783_v21  ;;  %vm1790_vm10 = vweird.f32 %v1783_v21 }
0x1174   : > { %v2234_v22 = vpop.eup %2233 }
0x1175   : > { %v1785_v23 = vmul.f32 %v2234_v22, %v1783_v21  ;;  %vm1791_vm1 = vweird.f32 %v2234_v22 }
0x1176   : > { %vm1792_vm11 = vmor %vm1790_vm10, %vm1791_vm1 }
0x1177   : > { %v1786_v24 = vmul.f32 %v2234_v22, %v1785_v23 }
0x1179   : > { %v1787_v25 = vmul.f32 0.5, %v1786_v24 }
0x117b   : > { %v1788_v26 = vsub.f32 1.5, %v1787_v25 }
0x117d   : > { %v1789_v27 = vmul.f32 %v2234_v22, %v1788_v26 }
0x117f   : > { %v1793_v29 = vsel %vm1792_vm11, %v2234_v22, %v1789_v27 }
0x1180   : > { %v1794_v30 = vmul.f32 %v1793_v29, %v1777_v13 }
0x1182   : > { %v1798_v32 = vmul.f32 %v2183_v28, %v1794_v30  ;;  %v1900_v28 = vld [vmem:[%s3002_s17] sm:$0x1] }
0x1184   : > { %v1802_v35 = vadd.f32 %v2184_v31, %v1798_v32 }
0x1186   : > { %2095 = vmatmul.msk.f32.vlgmr.msrb.gmra.mxu0 %vm805_vm9, %v1802_v35  ;;  %v1931_v35 = vld [vmem:[%s3061_s23] sm:$0x1] }
0x1203   : > { %v1833_v50 = vpop.f32.mrf.mxu0 }
0x1204   : > { %v1834_v52 = vadd.f32 %v2185_v48, %v1833_v50 }
0x1206   : > { %v2096_v54 = vmul.f32 -1.702, %v1834_v52 }
0x1208   : > { %v1838_v55 = vmul.f32 1.442695, %v2096_v54 }
0x120a   : > { %2235 = vpow2.f32 %v1838_v55 }
0x1210   : > { %v2236_v56 = vpop.eup %2235 }
0x1211   : > { %v1840_v57 = vadd.f32 1.0, %v2236_v56 }
0x1213   : > { %2237 = vrcp.f32 %v1840_v57  ;;  %v1852_v62 = vand.u32 2147483648, %v1840_v57  ;;  %v1850_v0 = vand.u32 2147483647, %v1840_v57  ;;  %vm1846_vm13 = vweird.f32 %v1840_v57 }
0x1215   : > { %v1853_v2 = vor.u32 1.1754944e-38, %v1852_v62  ;;  %vm1851_vm15 = vcmp.eq.f32.partialorder %v1850_v0, 8.507059e+37 }
0x1219   : > { %v2238_v59 = vpop.eup %2237 }
0x121a   : > { %v1842_v60 = vmul.f32 %v2238_v59, %v1840_v57  ;;  %vm1847_vm12 = vweird.f32 %v2238_v59 }
0x121b   : > { %vm1848_vm14 = vmor %vm1846_vm13, %vm1847_vm12 }
0x121c   : > { %v1843_v61 = vsub.f32 1.0, %v1842_v60 }
0x121e   : > { %v1844_v63 = vmul.f32 %v2238_v59, %v1843_v61 }
0x1220   : > { %v1845_v1 = vadd.f32 %v2238_v59, %v1844_v63 }
0x1222   : > { %v1849_v3 = vsel %vm1848_vm14, %v2238_v59, %v1845_v1 }
0x1223   : > { %v1854_v4 = vsel %vm1851_vm15, %v1853_v2, %v1849_v3 }
0x1224   : > { %v1856_v5 = vmul.f32 %v1854_v4, %v1834_v52 }
0x1226   : > { %1895 = vmatmul.f32.vlgmr.msrb.gmra.mxu1 %v1856_v5 }
0x12a3   : > { %v1896_v7 = vpop.f32.mrf.mxu1 }
0x12a4   : > { %v1897_v8 = vadd.f32 %v2186_v6, %v1896_v7 }
0x12a6   : > { %v1899_v10 = vadd.f32 %v1897_v8, %v2847_v9  ;;  %v1928_v9 = vld [vmem:[%s3004_s19 + $0x8] sm:$0xff] }
0x12a7   : > { %1949 = vmatpush.msrb.mxu2 %v1928_v9 }
0x12a8   : > { %v1903_v11 = vsel %vm1902_vm0, %v1899_v10, 0.0 }
0x12a9   : > { %1904 = vadd.xlane.f32.xlu1 %v1903_v11  ;;  %1950 = vmatpush.msrb.mxu2 %v1927_v18 }
0x131c   : > { %v1905_v12 = vpop.xlane.xlu1 %1904 }
0x131d   : > { %v1906_v13 = vmul.f32 %v1905_v12, %v2556_v38 }
0x131f   : > { %v1907_v14 = vsub.f32 %v1899_v10, %v1906_v13 }
0x1321   : > { %v1908_v15 = vmul.f32 %v1907_v14, %v1907_v14 }
0x1323   : > { %v1909_v16 = vsel %vm1902_vm0, %v1908_v15, 0.0 }
0x1324   : > { %1910 = vadd.xlane.f32.xlu2 %v1909_v16 }
0x1397   : > { %v1911_v19 = vpop.xlane.xlu2 %1910 }
0x1398   : > { %v1912_v20 = vmul.f32 %v1911_v19, %v2556_v38  ;;  %v1901_v38 = vld [vmem:[%s3003_s18] sm:$0x1] }
0x139a   : > { %v1913_v21 = vadd.f32 1e-05, %v1912_v20 }
0x139c   : > { %2239 = vrsqrt.f32 %v1913_v21  ;;  %vm1920_vm3 = vweird.f32 %v1913_v21 }
0x13a2   : > { %v2240_v22 = vpop.eup %2239 }
0x13a3   : > { %v1915_v23 = vmul.f32 %v2240_v22, %v1913_v21  ;;  %vm1921_vm2 = vweird.f32 %v2240_v22 }
0x13a4   : > { %vm1922_vm4 = vmor %vm1920_vm3, %vm1921_vm2 }
0x13a5   : > { %v1916_v24 = vmul.f32 %v2240_v22, %v1915_v23 }
0x13a7   : > { %v1917_v25 = vmul.f32 0.5, %v1916_v24 }
0x13a9   : > { %v1918_v26 = vsub.f32 1.5, %v1917_v25 }
0x13ab   : > { %v1919_v27 = vmul.f32 %v2240_v22, %v1918_v26 }
0x13ad   : > { %v1923_v29 = vsel %vm1922_vm4, %v2240_v22, %v1919_v27 }
0x13ae   : > { %v1924_v30 = vmul.f32 %v1923_v29, %v1907_v14 }
0x13b0   : > { %v1925_v31 = vmul.f32 %v1924_v30, %v1900_v28 }
0x13b2   : > { %v1926_v32 = vadd.f32 %v1925_v31, %v1901_v38 }
0x13b4   : > { %2114 = vmatmul.msk.f32.vlgmr.msrb.gmra.mxu2 %vm805_vm9, %v1926_v32 }
0x1437   : > { %v1952_v36 = vpop.f32.mrf.mxu2 }
0x1438   : > { %v1953_v37 = vadd.f32 %v1952_v36, %v1931_v35 }
0x143a   : > { %1956 = vst.msk [vmem:[%s648_s26] sm:$0x1] %vm1955_vm5, %v1953_v37 }
0x143b   : > { %2268 = shalt.err (!%p2265_p3)
}
0x143c   : > { %2118 = dma.vmem_to_hbm [thread:$0]  (%p2465_p5), %s1969_s5, 16, %s1971_s6, %s1958_s1  }
0x143d PF: > { %s3063_s22 = sld [smem:[#allocation7_spill]] }
0x143e   : > { %s3064_s30 = sld [smem:[#allocation5_spill]] }
0x1443   : > { %p2124_p4 = scmp.ge.s32.totalorder %s3063_s22, 2 }
0x1444   : > { %s1982_s26 = sand.u32 1, %s3064_s30  }
0x1445   : > { %p2121_p7 = pnand %p2124_p4, %p2469_p6  ;;  %s1983_s3 = scalar_lea.sflag [#allocation3], %s1982_s26 }
0x1447   : > { %p2122_p8 = pneg %p2121_p7 }
0x1449   : > { %2286 = dma.done.wait (%p2122_p8), %s1983_s3, 16  }
0x144a   : > { %2288 = vsyncadd (%p2122_p8), %s1983_s3, 4294967280  ;;  %s3066_s27 = sld [smem:[#allocation8_spill]]  ;;  %s3069_s2 = smov %s2295_s25 }
0x144b   : > { %s3067_s7 = sld [smem:[#allocation6_spill]] }
0x144c   : > { %s3068_s26 = sld [smem:[#allocation9_spill]] }
0x1450   : > { %p31_p9 = scmp.ge.s32.totalorder %s3066_s27, 4  }
0x1451   : > { %s3070_s25 = smov %s3067_s7 }
0x1452   :  { %33 = sbr.rel (!%p31_p9) target bundleno = 13 (0xd), region = 151 }
0x1457   :  { %1988 = vsyncpa [#allocation3], 1 }
0x1458   :  { %1990 = vsyncpa [#allocation3 + $0x1], 1 }

</bundles_post_ra>
